<compile_context>
chip_gen: v5e
topology: v5e:2x2
jax: 0.10.0
libtpu: 0.0.40
codegen_flags: <defaults>
</compile_context>

<pallas_src>
import functools

import jax
import jax.numpy as jnp
from jax.experimental import pallas as pl
from jax.experimental.pallas import tpu as pltpu


def graphconv_kernel(x0_ref, sup_ref, w_ref, bias_ref, out_ref, xlin_ref, *,
                     n_supports, max_step):
    # x0_ref  : (N_pad, tb*F_in)       f32 inputs, batch packed along lanes (b, d)
    # sup_ref : (S, N_pad, N_pad)      bf16 diffusion supports (grid-invariant)
    # w_ref   : (M*tb*F_in, tb*F_out)  bf16 block-diagonal Linear weight
    # bias_ref: (1, tb*F_out)          f32
    # out_ref : (N_pad, tb*F_out)      batch packed along lanes (b, o)
    # xlin_ref: (N_pad, M*tb*F_in)     f32 scratch holding the M diffusion metrics
    tbf = x0_ref.shape[1]

    x0 = x0_ref[...].astype(jnp.float32)
    xlin_ref[:, 0:tbf] = x0
    mi = 1
    # Literal transcription of the PyTorch recurrence (x0 intentionally carries
    # over between supports, exactly like the reference module).
    if max_step > 0:
        for s in range(n_supports):
            sup = sup_ref[s]                                      # (N_pad, N_pad) bf16
            # One MXU matmul per diffusion step covers every batch element.
            x1 = jnp.dot(sup, x0.astype(jnp.bfloat16),
                         preferred_element_type=jnp.float32)
            xlin_ref[:, mi * tbf:(mi + 1) * tbf] = x1
            mi += 1
            for _ in range(2, max_step + 1):
                # MXU in bf16, recurrence arithmetic in f32 on the VPU.
                x2 = 2.0 * jnp.dot(sup, x1.astype(jnp.bfloat16),
                                   preferred_element_type=jnp.float32) - x0
                xlin_ref[:, mi * tbf:(mi + 1) * tbf] = x2
                mi += 1
                x1, x0 = x2, x1

    # Fused Linear: single stacked MXU matmul against the block-diagonal weight,
    # batch stays in lanes -> lane-packed (b, o) output, no sub-vreg slicing.
    out = jnp.dot(xlin_ref[...].astype(jnp.bfloat16), w_ref[...],
                  preferred_element_type=jnp.float32)
    out_ref[...] = (out + bias_ref[...]).astype(out_ref.dtype)


def graphconv_dense_forward(inputs, supports, weight, bias, max_step, *,
                            batch_tile=None):
    """inputs: [B, N, F_in]; supports: list of dense [N, N];
    weight: [F_out, F_in*(max_step*len(supports)+1)]; bias: [F_out]
    -> [B, N, F_out]."""
    sup = jnp.stack([jnp.asarray(s) for s in supports], axis=0)       # [S, N, N]
    B, N, F_in = inputs.shape
    S = sup.shape[0]
    M = max_step * S + 1
    F_out, w_cols = weight.shape
    assert w_cols == F_in * M

    # --- batch tile ----------------------------------------------------------
    if batch_tile is None:
        # Prefer a tile wide enough to fill 128 lanes in the diffusion dots;
        # otherwise split the batch in two so a second TensorCore (v7x) gets a
        # "parallel" grid step.
        tb = B
        for cand in range(1, B + 1):
            if B % cand == 0 and cand * F_in >= 128:
                tb = cand
                break
        if tb == B and B > 1 and B % 2 == 0:
            tb = B // 2
    else:
        tb = batch_tile
    assert B % tb == 0
    n_tiles = B // tb

    # --- layout plumbing (host-side JAX glue; the weight/bias/support work is
    # parameter-side and would be hoisted to load time in a real model) -------
    N_pad = ((N + 127) // 128) * 128          # clean (8,128)/MXU boundaries

    # x0: [n_tiles, N_pad, tb*F_in], lane order (b_local, d).
    x0 = jnp.transpose(inputs, (1, 0, 2)).reshape(N, B * F_in)
    x0 = jnp.pad(x0, ((0, N_pad - N), (0, 0)))
    x0 = x0.reshape(N_pad, n_tiles, tb * F_in).transpose(1, 0, 2)

    # Supports: zero-padded and cast to bf16 for the MXU (accumulation is f32;
    # padded rows/cols are zero so padded nodes never contaminate real ones).
    sup_p = jnp.pad(sup, ((0, 0), (0, N_pad - N), (0, N_pad - N)))
    sup_p = sup_p.astype(jnp.bfloat16)

    # Block-diagonal Linear weight: rows ordered (m, b_local, d), cols
    # (b_local, o); off-diagonal batch blocks are exactly zero.
    w2 = jnp.transpose(weight.reshape(F_out, F_in, M), (2, 1, 0))     # [M, F_in, F_out]
    eye_b = jnp.eye(tb, dtype=weight.dtype)
    w_big = jnp.einsum('mdo,bc->mbdco', w2, eye_b)
    w_big = w_big.reshape(M * tb * F_in, tb * F_out).astype(jnp.bfloat16)
    bias_big = jnp.tile(bias, tb).reshape(1, tb * F_out)              # f32

    # --- VMEM budget: supports/weight/bias single-buffered, x0/out double-buffered
    itemsize_out = jnp.dtype(inputs.dtype).itemsize
    vmem_needed = (S * N_pad * N_pad * 2                       # supports (bf16, x1)
                   + 2 * N_pad * tb * F_in * 4                 # x0 tiles
                   + 2 * N_pad * tb * F_out * itemsize_out     # out tiles
                   + M * tb * F_in * tb * F_out * 2            # block-diag weight
                   + tb * F_out * 4                            # bias
                   + N_pad * M * tb * F_in * 4)                # metrics scratch
    vmem_limit = int(min(max(2 * vmem_needed, 32 << 20), 56 << 20))   # v7x-safe ceiling

    kernel = functools.partial(graphconv_kernel, n_supports=S, max_step=max_step)

    out_packed = pl.pallas_call(
        kernel,
        out_shape=jax.ShapeDtypeStruct((n_tiles, N_pad, tb * F_out), inputs.dtype),
        grid=(n_tiles,),
        in_specs=[
            pl.BlockSpec((None, N_pad, tb * F_in), lambda i: (i, 0, 0)),
            pl.BlockSpec((S, N_pad, N_pad), lambda i: (0, 0, 0),
                         pipeline_mode=pl.Buffered(1)),        # grid-invariant
            pl.BlockSpec((M * tb * F_in, tb * F_out), lambda i: (0, 0),
                         pipeline_mode=pl.Buffered(1)),        # grid-invariant
            pl.BlockSpec((1, tb * F_out), lambda i: (0, 0),
                         pipeline_mode=pl.Buffered(1)),        # grid-invariant
        ],
        out_specs=pl.BlockSpec((None, N_pad, tb * F_out), lambda i: (i, 0, 0)),
        scratch_shapes=[pltpu.VMEM((N_pad, M * tb * F_in), jnp.float32)],
        compiler_params=pltpu.CompilerParams(
            dimension_semantics=("parallel",),
            vmem_limit_bytes=vmem_limit),
    )(x0, sup_p, w_big, bias_big)

    # Unpack [n_tiles, N_pad, tb*F_out] -> [B, N, F_out].
    out = out_packed.reshape(n_tiles, N_pad, tb, F_out)[:, :N]
    return out.transpose(0, 2, 1, 3).reshape(B, N, F_out)


if __name__ == "__main__":
    # Small shapes consistent with the module's forward.
    B, N, F_in, F_out = 4, 16, 8, 32
    n_supports, max_step = 2, 3
    M = max_step * n_supports + 1

    key = jax.random.PRNGKey(0)
    k_in, k_s0, k_s1, k_w, k_b = jax.random.split(key, 5)

    inputs = jax.random.normal(k_in, (B, N, F_in), dtype=jnp.float32)

    def random_walk_support(k):
        # Row-stochastic dense support (stands in for the module's sparse
        # normalized diffusion matrices; keeps the Chebyshev recurrence bounded).
        a = jax.random.uniform(k, (N, N), dtype=jnp.float32) + 0.1
        return a / jnp.sum(a, axis=1, keepdims=True)

    supports = [random_walk_support(k_s0), random_walk_support(k_s1)]

    # Deterministic Linear(F_in*M -> F_out) init (PyTorch-default-style uniform).
    fan_in = F_in * M
    bound = 1.0 / (fan_in ** 0.5)
    weight = jax.random.uniform(k_w, (F_out, fan_in), minval=-bound, maxval=bound,
                                dtype=jnp.float32)
    bias = jax.random.uniform(k_b, (F_out,), minval=-bound, maxval=bound,
                              dtype=jnp.float32)

    # Pure-JAX f32 reference: literal transcription of the PyTorch forward.
    x0 = jnp.transpose(inputs, (1, 2, 0)).reshape(N, F_in * B)        # col = d*B + b
    xs = [x0]
    if max_step > 0:
        for sup_m in supports:
            x1 = sup_m @ x0
            xs.append(x1)
            for _ in range(2, max_step + 1):
                x2 = 2.0 * (sup_m @ x1) - x0
                xs.append(x2)
                x1, x0 = x2, x1
    xstack = jnp.stack(xs, axis=0)                                    # [M, N, F_in*B]
    feat = jnp.swapaxes(xstack.reshape(M, N, F_in, B), 0, 3)          # [B, N, F_in, M]
    ref = feat.reshape(B, N, F_in * M) @ weight.T + bias              # [B, N, F_out]

    # Run the kernel under several batch tilings: default (multi-step "parallel"
    # grid), tb=1 (degenerate block-diag), tb=B (whole batch, 128-lane output).
    # bf16 MXU dots vs an f32 reference -> tolerances relaxed accordingly.
    for bt in (None, 1, B):
        out = graphconv_dense_forward(inputs, supports, weight, bias, max_step,
                                      batch_tile=bt)
        out = jax.block_until_ready(out)
        assert out.shape == (B, N, F_out)
        assert jnp.allclose(out, ref, atol=4e-2, rtol=4e-2), (
            f"mismatch vs reference (batch_tile={bt})")

    print("KERNEL_OK")
</pallas_src>

<mosaic_0001>
module attributes {stable_mosaic.version = 11 : i64} {
  func.func @graphconv_kernel(%arg0: i32, %arg1: memref<1x128x16xf32, #tpu.memory_space<vmem>>, %arg2: memref<2x128x128xbf16, #tpu.memory_space<vmem>>, %arg3: memref<112x64xbf16, #tpu.memory_space<vmem>>, %arg4: memref<1x64xf32, #tpu.memory_space<vmem>>, %arg5: memref<1x128x64xf32, #tpu.memory_space<vmem>>, %arg6: memref<128x112xf32, #tpu.memory_space<vmem>>) attributes {dimension_semantics = [#tpu.dimension_semantics<parallel>], iteration_bounds = array<i64: 2>, scalar_prefetch = 0 : i64, scratch_operands = 1 : i64, tpu.core_type = #tpu.core_type<tc>, window_params = [{transform_indices = @transform_0, window_bounds = array<i64: 1, 128, 16>}, {pipeline_mode = #tpu.pipeline_mode<synchronous>, transform_indices = @transform_1, window_bounds = array<i64: 2, 128, 128>}, {pipeline_mode = #tpu.pipeline_mode<synchronous>, transform_indices = @transform_2, window_bounds = array<i64: 112, 64>}, {pipeline_mode = #tpu.pipeline_mode<synchronous>, transform_indices = @transform_3, window_bounds = array<i64: 1, 64>}, {transform_indices = @transform_4, window_bounds = array<i64: 1, 128, 64>}]} {
    %c0 = arith.constant 0 : index
    %c0_0 = arith.constant 0 : index
    %c0_1 = arith.constant 0 : index
    %0 = vector.load %arg1[%c0, %c0_0, %c0_1] : memref<1x128x16xf32, #tpu.memory_space<vmem>>, vector<1x128x16xf32>
    %1 = vector.shape_cast %0 : vector<1x128x16xf32> to vector<128x16xf32>
    %c0_2 = arith.constant 0 : index
    %c0_3 = arith.constant 0 : index
    %2 = vector.load %arg6[%c0_2, %c0_3] : memref<128x112xf32, #tpu.memory_space<vmem>>, vector<128x16xf32>
    tpu.vector_store %arg6[%c0_2, %c0_3], %1 {strides = array<i32>} : memref<128x112xf32, #tpu.memory_space<vmem>>, vector<128x16xf32>,
    %c0_4 = arith.constant 0 : index
    %c0_5 = arith.constant 0 : index
    %c0_6 = arith.constant 0 : index
    %3 = vector.load %arg2[%c0_4, %c0_5, %c0_6] : memref<2x128x128xbf16, #tpu.memory_space<vmem>>, vector<1x128x128xbf16>
    %4 = vector.shape_cast %3 : vector<1x128x128xbf16> to vector<128x128xbf16>
    %5 = arith.truncf %1 : vector<128x16xf32> to vector<128x16xbf16>
    %cst = arith.constant dense<0.000000e+00> : vector<128x16xf32>
    %6 = tpu.matmul %4, %5, %cst {dimension_numbers = #tpu.dot_dimension_numbers<[1], [0], [0], [1], [0, 0, 1, 1], [], []>} : vector<128x128xbf16>, vector<128x16xbf16>, vector<128x16xf32> -> vector<128x16xf32>
    %c0_7 = arith.constant 0 : index
    %c16 = arith.constant 16 : index
    %7 = vector.load %arg6[%c0_7, %c16] : memref<128x112xf32, #tpu.memory_space<vmem>>, vector<128x16xf32>
    tpu.vector_store %arg6[%c0_7, %c16], %6 {strides = array<i32>} : memref<128x112xf32, #tpu.memory_space<vmem>>, vector<128x16xf32>,
    %8 = arith.truncf %6 : vector<128x16xf32> to vector<128x16xbf16>
    %cst_8 = arith.constant dense<0.000000e+00> : vector<128x16xf32>
    %9 = tpu.matmul %4, %8, %cst_8 {dimension_numbers = #tpu.dot_dimension_numbers<[1], [0], [0], [1], [0, 0, 1, 1], [], []>} : vector<128x128xbf16>, vector<128x16xbf16>, vector<128x16xf32> -> vector<128x16xf32>
    %cst_9 = arith.constant 2.000000e+00 : f32
    %10 = vector.broadcast %cst_9 : f32 to vector<128x16xf32>
    %11 = arith.mulf %10, %9 : vector<128x16xf32>
    %12 = arith.subf %11, %1 : vector<128x16xf32>
    %c0_10 = arith.constant 0 : index
    %c32 = arith.constant 32 : index
    %13 = vector.load %arg6[%c0_10, %c32] : memref<128x112xf32, #tpu.memory_space<vmem>>, vector<128x16xf32>
    tpu.vector_store %arg6[%c0_10, %c32], %12 {strides = array<i32>} : memref<128x112xf32, #tpu.memory_space<vmem>>, vector<128x16xf32>,
    %14 = arith.truncf %12 : vector<128x16xf32> to vector<128x16xbf16>
    %cst_11 = arith.constant dense<0.000000e+00> : vector<128x16xf32>
    %15 = tpu.matmul %4, %14, %cst_11 {dimension_numbers = #tpu.dot_dimension_numbers<[1], [0], [0], [1], [0, 0, 1, 1], [], []>} : vector<128x128xbf16>, vector<128x16xbf16>, vector<128x16xf32> -> vector<128x16xf32>
    %cst_12 = arith.constant 2.000000e+00 : f32
    %16 = vector.broadcast %cst_12 : f32 to vector<128x16xf32>
    %17 = arith.mulf %16, %15 : vector<128x16xf32>
    %18 = arith.subf %17, %6 : vector<128x16xf32>
    %c0_13 = arith.constant 0 : index
    %c48 = arith.constant 48 : index
    %19 = vector.load %arg6[%c0_13, %c48] : memref<128x112xf32, #tpu.memory_space<vmem>>, vector<128x16xf32>
    tpu.vector_store %arg6[%c0_13, %c48], %18 {strides = array<i32>} : memref<128x112xf32, #tpu.memory_space<vmem>>, vector<128x16xf32>,
    %c1 = arith.constant 1 : index
    %c0_14 = arith.constant 0 : index
    %c0_15 = arith.constant 0 : index
    %20 = vector.load %arg2[%c1, %c0_14, %c0_15] : memref<2x128x128xbf16, #tpu.memory_space<vmem>>, vector<1x128x128xbf16>
    %21 = vector.shape_cast %20 : vector<1x128x128xbf16> to vector<128x128xbf16>
    %22 = arith.truncf %12 : vector<128x16xf32> to vector<128x16xbf16>
    %cst_16 = arith.constant dense<0.000000e+00> : vector<128x16xf32>
    %23 = tpu.matmul %21, %22, %cst_16 {dimension_numbers = #tpu.dot_dimension_numbers<[1], [0], [0], [1], [0, 0, 1, 1], [], []>} : vector<128x128xbf16>, vector<128x16xbf16>, vector<128x16xf32> -> vector<128x16xf32>
    %c0_17 = arith.constant 0 : index
    %c64 = arith.constant 64 : index
    %24 = vector.load %arg6[%c0_17, %c64] : memref<128x112xf32, #tpu.memory_space<vmem>>, vector<128x16xf32>
    tpu.vector_store %arg6[%c0_17, %c64], %23 {strides = array<i32>} : memref<128x112xf32, #tpu.memory_space<vmem>>, vector<128x16xf32>,
    %25 = arith.truncf %23 : vector<128x16xf32> to vector<128x16xbf16>
    %cst_18 = arith.constant dense<0.000000e+00> : vector<128x16xf32>
    %26 = tpu.matmul %21, %25, %cst_18 {dimension_numbers = #tpu.dot_dimension_numbers<[1], [0], [0], [1], [0, 0, 1, 1], [], []>} : vector<128x128xbf16>, vector<128x16xbf16>, vector<128x16xf32> -> vector<128x16xf32>
    %cst_19 = arith.constant 2.000000e+00 : f32
    %27 = vector.broadcast %cst_19 : f32 to vector<128x16xf32>
    %28 = arith.mulf %27, %26 : vector<128x16xf32>
    %29 = arith.subf %28, %12 : vector<128x16xf32>
    %c0_20 = arith.constant 0 : index
    %c80 = arith.constant 80 : index
    %30 = vector.load %arg6[%c0_20, %c80] : memref<128x112xf32, #tpu.memory_space<vmem>>, vector<128x16xf32>
    tpu.vector_store %arg6[%c0_20, %c80], %29 {strides = array<i32>} : memref<128x112xf32, #tpu.memory_space<vmem>>, vector<128x16xf32>,
    %31 = arith.truncf %29 : vector<128x16xf32> to vector<128x16xbf16>
    %cst_21 = arith.constant dense<0.000000e+00> : vector<128x16xf32>
    %32 = tpu.matmul %21, %31, %cst_21 {dimension_numbers = #tpu.dot_dimension_numbers<[1], [0], [0], [1], [0, 0, 1, 1], [], []>} : vector<128x128xbf16>, vector<128x16xbf16>, vector<128x16xf32> -> vector<128x16xf32>
    %cst_22 = arith.constant 2.000000e+00 : f32
    %33 = vector.broadcast %cst_22 : f32 to vector<128x16xf32>
    %34 = arith.mulf %33, %32 : vector<128x16xf32>
    %35 = arith.subf %34, %23 : vector<128x16xf32>
    %c0_23 = arith.constant 0 : index
    %c96 = arith.constant 96 : index
    %36 = vector.load %arg6[%c0_23, %c96] : memref<128x112xf32, #tpu.memory_space<vmem>>, vector<128x16xf32>
    tpu.vector_store %arg6[%c0_23, %c96], %35 {strides = array<i32>} : memref<128x112xf32, #tpu.memory_space<vmem>>, vector<128x16xf32>,
    %c0_24 = arith.constant 0 : index
    %c0_25 = arith.constant 0 : index
    %37 = vector.load %arg6[%c0_24, %c0_25] : memref<128x112xf32, #tpu.memory_space<vmem>>, vector<128x112xf32>
    %38 = arith.truncf %37 : vector<128x112xf32> to vector<128x112xbf16>
    %c0_26 = arith.constant 0 : index
    %c0_27 = arith.constant 0 : index
    %39 = vector.load %arg3[%c0_26, %c0_27] : memref<112x64xbf16, #tpu.memory_space<vmem>>, vector<112x64xbf16>
    %cst_28 = arith.constant dense<0.000000e+00> : vector<128x64xf32>
    %40 = tpu.matmul %38, %39, %cst_28 {dimension_numbers = #tpu.dot_dimension_numbers<[1], [0], [0], [1], [0, 0, 1, 1], [], []>} : vector<128x112xbf16>, vector<112x64xbf16>, vector<128x64xf32> -> vector<128x64xf32>
    %c0_29 = arith.constant 0 : index
    %c0_30 = arith.constant 0 : index
    %41 = vector.load %arg4[%c0_29, %c0_30] : memref<1x64xf32, #tpu.memory_space<vmem>>, vector<1x64xf32>
    %42 = vector.broadcast %41 : vector<1x64xf32> to vector<128x64xf32>
    %43 = arith.addf %40, %42 : vector<128x64xf32>
    %c0_31 = arith.constant 0 : index
    %c0_32 = arith.constant 0 : index
    %c0_33 = arith.constant 0 : index
    %44 = vector.load %arg5[%c0_31, %c0_32, %c0_33] : memref<1x128x64xf32, #tpu.memory_space<vmem>>, vector<1x128x64xf32>
    %45 = vector.shape_cast %44 : vector<1x128x64xf32> to vector<128x64xf32>
    %46 = vector.shape_cast %43 : vector<128x64xf32> to vector<1x128x64xf32>
    tpu.vector_store %arg5[%c0_31, %c0_32, %c0_33], %46 {strides = array<i32>} : memref<1x128x64xf32, #tpu.memory_space<vmem>>, vector<1x128x64xf32>,
    return
  }
  func.func @transform_0(%arg0: i32) -> (i32, i32, i32) {
    %c0_i32 = arith.constant 0 : i32
    %c0_i32_0 = arith.constant 0 : i32
    %c0_i32_1 = arith.constant 0 : i32
    return %arg0, %c0_i32, %c0_i32_0 : i32, i32, i32
  }
  func.func @transform_1(%arg0: i32) -> (i32, i32, i32) {
    %c0_i32 = arith.constant 0 : i32
    %c0_i32_0 = arith.constant 0 : i32
    %c0_i32_1 = arith.constant 0 : i32
    %c0_i32_2 = arith.constant 0 : i32
    return %c0_i32, %c0_i32_0, %c0_i32_1 : i32, i32, i32
  }
  func.func @transform_2(%arg0: i32) -> (i32, i32) {
    %c0_i32 = arith.constant 0 : i32
    %c0_i32_0 = arith.constant 0 : i32
    %c0_i32_1 = arith.constant 0 : i32
    return %c0_i32, %c0_i32_0 : i32, i32
  }
  func.func @transform_3(%arg0: i32) -> (i32, i32) {
    %c0_i32 = arith.constant 0 : i32
    %c0_i32_0 = arith.constant 0 : i32
    %c0_i32_1 = arith.constant 0 : i32
    return %c0_i32, %c0_i32_0 : i32, i32
  }
  func.func @transform_4(%arg0: i32) -> (i32, i32, i32) {
    %c0_i32 = arith.constant 0 : i32
    %c0_i32_0 = arith.constant 0 : i32
    %c0_i32_1 = arith.constant 0 : i32
    return %arg0, %c0_i32, %c0_i32_0 : i32, i32, i32
  }
}

</mosaic_0001>

<bundles_post_ra>
// kernel: tpu_custom_call.1
= control target key start
LH: loop header
LB: loop body
LE: loop exit
PB: predicated region body
PF: predicated region fallthrough
CT: control target
= control target key end

     0   :  { %s1769_s15 = smov 0   ;;  %s2586_s0 = inlined_call_operand.vmem [shape: f32[2,128,16], index: 0, kind: input, shape index: {}]   ;;  %s2587_s1 = inlined_call_operand.vmem [shape: bf16[2,128,128], index: 1, kind: input, shape index: {}]   ;;  %s2588_s2 = inlined_call_operand.vmem [shape: bf16[112,64], index: 2, kind: input, shape index: {}]   ;;  %s2589_s3 = inlined_call_operand.vmem [shape: f32[1,64], index: 3, kind: input, shape index: {}]   ;;  %s2590_s4 = inlined_call_operand.vmem [shape: f32[2,128,64], index: 4, kind: output, shape index: {}]  }
   0x1 LB: > { %s1539_s16 = sadd.s32 4294967295, %s1736_s15   ;;  %p1543_p0 = scmp.ge.s32.totalorder %s1736_s15, 1  ;;  %s1736_s15 = sphi %s1769_s15, %s14_s15  }
   0x2   : > { %p162_p1 = scmp.lt.s32.totalorder %s1736_s15, 3 }
   0x4   : > { %p163_p2 = pnand %p1543_p0, %p162_p1 }
   0x5   : > { %p188_p3 = scmp.lt.s32.totalorder (!%p163_p2), %s1539_s16, 1  ;;  %s1738_s11 = smov (!%p163_p2), 16  }
   0x6   : > { %166 = sbr.rel (%p163_p2) target bundleno = 1631 (0x65f), region = 36  ;;  %s1739_s12 = smov (!%p163_p2), 32  }
   0x7   : > { %s1740_s6 = smov (!%p163_p2), 48   ;;  %s1741_s7 = smov (!%p163_p2), 64  }
   0x8   : > { %s1742_s8 = smov (!%p163_p2), 80   ;;  %s1743_s9 = smov (!%p163_p2), 96  }
   0xb   : > { %s2592_s16 = smov (!%p188_p3, %s1539_s16), 1  ;;  %v1854_v24 = vld [vmem:[%s2587_s1] sm:$0xff]  ;;  %v1859_v25 = vld [vmem:[%s2587_s1 + $0x10] sm:$0xff]  ;;  %v1866_v26 = vld [vmem:[%s2587_s1 + $0x8] sm:$0xff]  ;;  %vm215_vm0 = vcmask 130048   ;;  %vm417_vm1 = vcmask 261248  }
   0xc   : > { %s1666_s17 = sshll.u32 %s2592_s16, 7  ;;  %v1871_v27 = vld [vmem:[%s2587_s1 + $0x18] sm:$0xff]  ;;  %v1878_v28 = vld [vmem:[%s2587_s1 + $0x20] sm:$0xff]  ;;  %v1884_v29 = vld [vmem:[%s2587_s1 + $0x28] sm:$0xff]  ;;  %vm587_vm2 = vcmask 392448   ;;  %vm757_vm3 = vcmask 523648  }
   0xd   : > { %s1785_s20 = scalar_lea.vmem %s2586_s0, %s1666_s17  ;;  %v1890_v30 = vld [vmem:[%s2587_s1 + $0x30] sm:$0xff]  ;;  %v1896_v31 = vld [vmem:[%s2587_s1 + $0x38] sm:$0xff]  ;;  %vm952_vm4 = vcmask 654848   ;;  %vm1122_vm5 = vcmask 786048   ;;  %vm1292_vm6 = vcmask 917248   ;;  %vm1393_vm7 = vcmask 916480   ;;  %s2549_s5 = scalar_lea.vmem %s2590_s4, %s1666_s17 }
   0xe   : > { %v1788_v0 = vld [vmem:[%s1785_s20 + $0x70] sm:$0xff]  ;;  %v1791_v1 = vld [vmem:[%s1785_s20 + $0x78] sm:$0xff]  ;;  %v1794_v2 = vld [vmem:[%s1785_s20 + $0x60] sm:$0xff]  ;;  %vm1467_vm8 = vcmask 523264  }
   0xf   : > { %v255_v3 = vpack.c.bf16 %v1791_v1, %v1788_v0  ;;  %v1799_v4 = vld [vmem:[%s1785_s20 + $0x68] sm:$0xff]  ;;  %v1804_v6 = vld [vmem:[%s1785_s20 + $0x50] sm:$0xff]  ;;  %v1807_v7 = vld [vmem:[%s1785_s20 + $0x58] sm:$0xff]  ;;  %228 = vst.msk [vmem:[#allocation2 + $0x60] sm:$0xff] %vm215_vm0, %v1794_v2 }
  0x10   : > { %v254_v5 = vpack.c.bf16 %v1799_v4, %v1794_v2  ;;  %v253_v8 = vpack.c.bf16 %v1807_v7, %v1804_v6  ;;  %v1812_v9 = vld [vmem:[%s1785_s20 + $0x40] sm:$0xff]  ;;  %v1815_v10 = vld [vmem:[%s1785_s20 + $0x48] sm:$0xff]  ;;  %v1820_v12 = vld [vmem:[%s1785_s20 + $0x30] sm:$0xff]  ;;  %226 = vst.msk [vmem:[#allocation2 + $0x50] sm:$0xff] %vm215_vm0, %v1804_v6 }
  0x11   : > { %304 = vmatpush.bf16.msra.mxu0 %v255_v3  ;;  %1691 = vmatpush.bf16.msra.mxu3 %v255_v3  ;;  %v252_v11 = vpack.c.bf16 %v1815_v10, %v1812_v9  ;;  %v1823_v13 = vld [vmem:[%s1785_s20 + $0x38] sm:$0xff]  ;;  %v1828_v15 = vld [vmem:[%s1785_s20 + $0x20] sm:$0xff]  ;;  %v1831_v16 = vld [vmem:[%s1785_s20 + $0x28] sm:$0xff]  ;;  %222 = vst.msk [vmem:[#allocation2 + $0x30] sm:$0xff] %vm215_vm0, %v1820_v12 }
  0x12   : > { %v251_v14 = vpack.c.bf16 %v1823_v13, %v1820_v12  ;;  %v250_v17 = vpack.c.bf16 %v1831_v16, %v1828_v15  ;;  %v1836_v18 = vld [vmem:[%s1785_s20 + $0x10] sm:$0xff]  ;;  %v1839_v19 = vld [vmem:[%s1785_s20 + $0x18] sm:$0xff]  ;;  %v1844_v21 = vld [vmem:[%s1785_s20] sm:$0xff]  ;;  %220 = vst.msk [vmem:[#allocation2 + $0x20] sm:$0xff] %vm215_vm0, %v1828_v15 }
  0x13   : > { %v249_v20 = vpack.c.bf16 %v1839_v19, %v1836_v18  ;;  %v1847_v22 = vld [vmem:[%s1785_s20 + $0x8] sm:$0xff]  ;;  %216 = vst.msk [vmem:[#allocation2] sm:$0xff] %vm215_vm0, %v1844_v21 }
  0x14   : > { %v248_v23 = vpack.c.bf16 %v1847_v22, %v1844_v21  ;;  %217 = vst.msk [vmem:[#allocation2 + $0x8] sm:$0xff] %vm215_vm0, %v1847_v22 }
  0x15   : > { %305 = vmatpush.bf16.msra.mxu0 %v254_v5  ;;  %1692 = vmatpush.bf16.msra.mxu3 %v254_v5  ;;  %218 = vst.msk [vmem:[#allocation2 + $0x10] sm:$0xff] %vm215_vm0, %v1836_v18 }
  0x16   : > { %219 = vst.msk [vmem:[#allocation2 + $0x18] sm:$0xff] %vm215_vm0, %v1839_v19 }
  0x17   : > { %221 = vst.msk [vmem:[#allocation2 + $0x28] sm:$0xff] %vm215_vm0, %v1831_v16 }
  0x18   : > { %223 = vst.msk [vmem:[#allocation2 + $0x38] sm:$0xff] %vm215_vm0, %v1823_v13 }
  0x19   : > { %306 = vmatpush.bf16.msra.mxu0 %v253_v8  ;;  %1693 = vmatpush.bf16.msra.mxu3 %v253_v8  ;;  %224 = vst.msk [vmem:[#allocation2 + $0x40] sm:$0xff] %vm215_vm0, %v1812_v9 }
  0x1a   : > { %225 = vst.msk [vmem:[#allocation2 + $0x48] sm:$0xff] %vm215_vm0, %v1815_v10 }
  0x1b   : > { %227 = vst.msk [vmem:[#allocation2 + $0x58] sm:$0xff] %vm215_vm0, %v1807_v7 }
  0x1c   : > { %229 = vst.msk [vmem:[#allocation2 + $0x68] sm:$0xff] %vm215_vm0, %v1799_v4 }
  0x1d   : > { %307 = vmatpush.bf16.msra.mxu0 %v252_v11  ;;  %1694 = vmatpush.bf16.msra.mxu3 %v252_v11  ;;  %230 = vst.msk [vmem:[#allocation2 + $0x70] sm:$0xff] %vm215_vm0, %v1788_v0 }
  0x1e   : > { %231 = vst.msk [vmem:[#allocation2 + $0x78] sm:$0xff] %vm215_vm0, %v1791_v1 }
  0x21   : > { %308 = vmatpush.bf16.msra.mxu0 %v251_v14  ;;  %1695 = vmatpush.bf16.msra.mxu3 %v251_v14 }
  0x25   : > { %309 = vmatpush.bf16.msra.mxu0 %v250_v17  ;;  %1696 = vmatpush.bf16.msra.mxu3 %v250_v17 }
  0x29   : > { %310 = vmatpush.bf16.msra.mxu0 %v249_v20  ;;  %1697 = vmatpush.bf16.msra.mxu3 %v249_v20 }
  0x2d   : > { %311 = vmatpush.bf16.msra.mxu0 %v248_v23  ;;  %1698 = vmatpush.bf16.msra.mxu3 %v248_v23 }
  0x30   : > { %312 = vmatmul.bf16.vlgmr.msra.gmra.mxu0 %v1854_v24  ;;  %322 = vmatmul.bf16.vlgmr.msra.gmra.mxu3 %v1859_v25 }
  0x40   : > { %317 = vmatmul.bf16.gmra.mxu0 %v1866_v26  ;;  %327 = vmatmul.bf16.gmra.mxu3 %v1871_v27 }
  0x50   : > { %332 = vmatmul.bf16.gmra.mxu3 %v1878_v28 }
  0x60   : > { %337 = vmatmul.bf16.gmra.mxu3 %v1884_v29 }
  0x70   : > { %342 = vmatmul.bf16.gmra.mxu3 %v1890_v30 }
  0x80   : > { %347 = vmatmul.bf16.gmra.mxu3 %v1896_v31 }
  0xad   : > { %v1899_v32 = vpop.f32.mrf.mxu0 }
  0xae   : > { %369 = vrot.lane.b32.xlu0 %v1899_v32, %s1738_s11 }
  0xb3   : > { %v1903_v33 = vpop.f32.mrf.mxu3 }
  0xb5   : > { %v1905_v34 = vpop.f32.mrf.mxu0 }
  0xb6   : > { %377 = vrot.lane.b32.xlu0 %v1903_v33, %s1738_s11  ;;  %v434_v57 = vpack.c.bf16 %v1905_v34, %v1899_v32 }
  0xbb   : > { %v1909_v35 = vpop.f32.mrf.mxu3 }
  0xbc   : > { %379 = vrot.lane.b32.xlu1 %v1909_v35, %s1738_s11  ;;  %v436_v54 = vpack.c.bf16 %v1909_v35, %v1903_v33 }
  0xbd   : > { %v1913_v36 = vpop.f32.mrf.mxu0 }
  0xbe   : > { %371 = vrot.lane.b32.xlu0 %v1905_v34, %s1738_s11 }
  0xc3   : > { %v1917_v37 = vpop.f32.mrf.mxu3 }
  0xc5   : > { %v1919_v38 = vpop.f32.mrf.mxu0 }
  0xc6   : > { %373 = vrot.lane.b32.xlu0 %v1913_v36, %s1738_s11  ;;  %375 = vrot.lane.b32.xlu1 %v1919_v38, %s1738_s11  ;;  %v435_v55 = vpack.c.bf16 %v1919_v38, %v1913_v36 }
  0xcb   : > { %v1925_v39 = vpop.f32.mrf.mxu3 }
  0xcc   : > { %v437_v52 = vpack.c.bf16 %v1925_v39, %v1917_v37 }
  0xce   : > { %381 = vrot.lane.b32.xlu0 %v1917_v37, %s1738_s11  ;;  %383 = vrot.lane.b32.xlu1 %v1925_v39, %s1738_s11 }
  0xd3   : > { %v1931_v40 = vpop.f32.mrf.mxu3 }
  0xd6   : > { %385 = vrot.lane.b32.xlu0 %v1931_v40, %s1738_s11 }
  0xdb   : > { %v1935_v41 = vpop.f32.mrf.mxu3 }
  0xdc   : > { %387 = vrot.lane.b32.xlu1 %v1935_v41, %s1738_s11  ;;  %v438_v51 = vpack.c.bf16 %v1935_v41, %v1931_v40 }
  0xe3   : > { %v1939_v42 = vpop.f32.mrf.mxu3 }
  0xe4   : > { %389 = vrot.lane.b32.xlu0 %v1939_v42, %s1738_s11 }
  0xeb   : > { %v1943_v43 = vpop.f32.mrf.mxu3 }
  0xec   : > { %391 = vrot.lane.b32.xlu1 %v1943_v43, %s1738_s11  ;;  %v439_v50 = vpack.c.bf16 %v1943_v43, %v1939_v42 }
  0xf3   : > { %v1947_v44 = vpop.f32.mrf.mxu3 }
  0xfb   : > { %v1949_v45 = vpop.f32.mrf.mxu3 }
  0xfc   : > { %v440_v49 = vpack.c.bf16 %v1949_v45, %v1947_v44 }
 0x103   : > { %v1959_v46 = vpop.f32.mrf.mxu3 }
 0x10b   : > { %v1977_v47 = vpop.f32.mrf.mxu3 }
 0x10c   : > { %v441_v48 = vpack.c.bf16 %v1977_v47, %v1959_v46 }
 0x10e   : > { %442 = vmatpush.bf16.msrb.mxu0 %v441_v48  ;;  %1699 = vmatpush.bf16.msra.mxu1 %v441_v48 }
 0x112   : > { %443 = vmatpush.bf16.msrb.mxu0 %v440_v49  ;;  %1700 = vmatpush.bf16.msra.mxu1 %v440_v49 }
 0x116   : > { %444 = vmatpush.bf16.msrb.mxu0 %v439_v50  ;;  %1701 = vmatpush.bf16.msra.mxu1 %v439_v50 }
 0x11a   : > { %445 = vmatpush.bf16.msrb.mxu0 %v438_v51  ;;  %1702 = vmatpush.bf16.msra.mxu1 %v438_v51 }
 0x11e   : > { %446 = vmatpush.bf16.msrb.mxu0 %v437_v52  ;;  %1703 = vmatpush.bf16.msra.mxu1 %v437_v52 }
 0x120   : > { %v370_v53 = vpop.permute.xlu0 %369 }
 0x121   : > { %418 = vst.msk [vmem:[#allocation2] sm:$0xff] %vm417_vm1, %v370_v53 }
 0x122   : > { %447 = vmatpush.bf16.msrb.mxu0 %v436_v54  ;;  %1704 = vmatpush.bf16.msra.mxu1 %v436_v54 }
 0x126   : > { %448 = vmatpush.bf16.msrb.mxu0 %v435_v55  ;;  %1705 = vmatpush.bf16.msra.mxu1 %v435_v55 }
 0x128   : > { %v378_v56 = vpop.permute.xlu0 %377 }
 0x129   : > { %422 = vst.msk [vmem:[#allocation2 + $0x20] sm:$0xff] %vm417_vm1, %v378_v56 }
 0x12a   : > { %449 = vmatpush.bf16.msrb.mxu0 %v434_v57  ;;  %1706 = vmatpush.bf16.msra.mxu1 %v434_v57 }
 0x12d   : > { %450 = vmatmul.bf16.vlgmr.msrb.gmra.mxu0 %v1854_v24  ;;  %460 = vmatmul.bf16.vlgmr.msra.gmra.mxu1 %v1859_v25 }
 0x12e   : > { %v380_v58 = vpop.permute.xlu1 %379 }
 0x12f   : > { %423 = vst.msk [vmem:[#allocation2 + $0x28] sm:$0xff] %vm417_vm1, %v380_v58 }
 0x130   : > { %v372_v59 = vpop.permute.xlu0 %371 }
 0x131   : > { %419 = vst.msk [vmem:[#allocation2 + $0x8] sm:$0xff] %vm417_vm1, %v372_v59 }
 0x138   : > { %v374_v60 = vpop.permute.xlu0 %373  ;;  %v376_v61 = vpop.permute.xlu1 %375 }
 0x139   : > { %420 = vst.msk [vmem:[#allocation2 + $0x10] sm:$0xff] %vm417_vm1, %v374_v60 }
 0x13a   : > { %421 = vst.msk [vmem:[#allocation2 + $0x18] sm:$0xff] %vm417_vm1, %v376_v61 }
 0x13d   : > { %455 = vmatmul.bf16.gmra.mxu0 %v1866_v26  ;;  %465 = vmatmul.bf16.gmra.mxu1 %v1871_v27 }
 0x140   : > { %v382_v62 = vpop.permute.xlu0 %381  ;;  %v384_v63 = vpop.permute.xlu1 %383 }
 0x141   : > { %424 = vst.msk [vmem:[#allocation2 + $0x30] sm:$0xff] %vm417_vm1, %v382_v62 }
 0x142   : > { %425 = vst.msk [vmem:[#allocation2 + $0x38] sm:$0xff] %vm417_vm1, %v384_v63 }
 0x148   : > { %v386_v3 = vpop.permute.xlu0 %385 }
 0x149   : > { %426 = vst.msk [vmem:[#allocation2 + $0x40] sm:$0xff] %vm417_vm1, %v386_v3 }
 0x14d   : > { %470 = vmatmul.bf16.gmra.mxu1 %v1878_v28 }
 0x14e   : > { %v388_v5 = vpop.permute.xlu1 %387 }
 0x14f   : > { %427 = vst.msk [vmem:[#allocation2 + $0x48] sm:$0xff] %vm417_vm1, %v388_v5 }
 0x156   : > { %v390_v8 = vpop.permute.xlu0 %389 }
 0x157   : > { %428 = vst.msk [vmem:[#allocation2 + $0x50] sm:$0xff] %vm417_vm1, %v390_v8 }
 0x15d   : > { %475 = vmatmul.bf16.gmra.mxu1 %v1884_v29 }
 0x15e   : > { %v392_v11 = vpop.permute.xlu1 %391 }
 0x15f   : > { %429 = vst.msk [vmem:[#allocation2 + $0x58] sm:$0xff] %vm417_vm1, %v392_v11 }
 0x16d   : > { %480 = vmatmul.bf16.gmra.mxu1 %v1890_v30 }
 0x17d   : > { %485 = vmatmul.bf16.gmra.mxu1 %v1896_v31 }
 0x1aa   : > { %v451_v14 = vpop.f32.mrf.mxu0  ;;  %v461_v17 = vpop.f32.mrf.mxu1 }
 0x1ab   : > { %v491_v20 = vmul.f32 2.0, %v451_v14  ;;  %v495_v23 = vmul.f32 2.0, %v461_v17 }
 0x1ad   : > { %v2024_v48 = vsub.f32 %v491_v20, %v1844_v21  ;;  %v2027_v49 = vsub.f32 %v495_v23, %v1828_v15 }
 0x1af   : > { %547 = vrot.lane.b32.xlu2 %v2027_v49, %s1739_s12  ;;  %539 = vrot.lane.b32.xlu1 %v2024_v48, %s1739_s12 }
 0x1b2   : > { %v453_v50 = vpop.f32.mrf.mxu0  ;;  %v463_v51 = vpop.f32.mrf.mxu1 }
 0x1b3   : > { %v492_v52 = vmul.f32 2.0, %v453_v50  ;;  %v496_v53 = vmul.f32 2.0, %v463_v51 }
 0x1b5   : > { %v2034_v54 = vsub.f32 %v492_v52, %v1847_v22  ;;  %v2037_v21 = vsub.f32 %v496_v53, %v1831_v16 }
 0x1b7   : > { %549 = vrot.lane.b32.xlu0 %v2037_v21, %s1739_s12  ;;  %541 = vrot.lane.b32.xlu1 %v2034_v54, %s1739_s12 }
 0x1ba   : > { %v456_v15 = vpop.f32.mrf.mxu0  ;;  %v466_v55 = vpop.f32.mrf.mxu1 }
 0x1bb   : > { %v493_v56 = vmul.f32 2.0, %v456_v15  ;;  %v497_v22 = vmul.f32 2.0, %v466_v55 }
 0x1bd   : > { %v2044_v57 = vsub.f32 %v493_v56, %v1836_v18  ;;  %v2049_v60 = vsub.f32 %v497_v22, %v1820_v12 }
 0x1bf   : > { %543 = vrot.lane.b32.xlu2 %v2044_v57, %s1739_s12 }
 0x1c2   : > { %v458_v58 = vpop.f32.mrf.mxu0  ;;  %v468_v59 = vpop.f32.mrf.mxu1 }
 0x1c3   : > { %v494_v16 = vmul.f32 2.0, %v458_v58  ;;  %v498_v18 = vmul.f32 2.0, %v468_v59 }
 0x1c5   : > { %v2052_v61 = vsub.f32 %v494_v16, %v1839_v19  ;;  %v2059_v3 = vsub.f32 %v498_v18, %v1823_v13  ;;  %v606_v18 = vpack.c.bf16 %v2037_v21, %v2027_v49 }
 0x1c7   : > { %551 = vrot.lane.b32.xlu2 %v2049_v60, %s1739_s12  ;;  %545 = vrot.lane.b32.xlu0 %v2052_v61, %s1739_s12 }
 0x1ca   : > { %v471_v62 = vpop.f32.mrf.mxu1 }
 0x1cb   : > { %v499_v63 = vmul.f32 2.0, %v471_v62  ;;  %v605_v62 = vpack.c.bf16 %v2052_v61, %v2044_v57 }
 0x1cd   : > { %v2062_v5 = vsub.f32 %v499_v63, %v1812_v9 }
 0x1cf   : > { %555 = vrot.lane.b32.xlu2 %v2062_v5, %s1739_s12  ;;  %553 = vrot.lane.b32.xlu0 %v2059_v3, %s1739_s12 }
 0x1d2   : > { %v473_v12 = vpop.f32.mrf.mxu1 }
 0x1d3   : > { %v500_v19 = vmul.f32 2.0, %v473_v12  ;;  %v604_v12 = vpack.c.bf16 %v2034_v54, %v2024_v48 }
 0x1d5   : > { %v2069_v8 = vsub.f32 %v500_v19, %v1815_v10  ;;  %v2117_v19 = vld [vmem:[%s2587_s1 + $0x40] sm:$0xff] }
 0x1d7   : > { %557 = vrot.lane.b32.xlu0 %v2069_v8, %s1739_s12 }
 0x1da   : > { %v476_v11 = vpop.f32.mrf.mxu1 }
 0x1db   : > { %v501_v13 = vmul.f32 2.0, %v476_v11 }
 0x1dd   : > { %v2074_v14 = vsub.f32 %v501_v13, %v1804_v6 }
 0x1df   : > { %559 = vrot.lane.b32.xlu2 %v2074_v14, %s1739_s12 }
 0x1e2   : > { %v478_v9 = vpop.f32.mrf.mxu1 }
 0x1e3   : > { %v502_v17 = vmul.f32 2.0, %v478_v9  ;;  %v2127_v9 = vld [vmem:[%s2587_s1 + $0x48] sm:$0xff] }
 0x1e5   : > { %v2079_v20 = vsub.f32 %v502_v17, %v1807_v7 }
 0x1e7   : > { %561 = vrot.lane.b32.xlu0 %v2079_v20, %s1739_s12 }
 0x1ea   : > { %v481_v10 = vpop.f32.mrf.mxu1 }
 0x1eb   : > { %v503_v6 = vmul.f32 2.0, %v481_v10  ;;  %v2138_v10 = vld [vmem:[%s2587_s1 + $0x50] sm:$0xff] }
 0x1ed   : > { %v2095_v58 = vsub.f32 %v503_v6, %v1794_v2  ;;  %v608_v2 = vpack.c.bf16 %v2069_v8, %v2062_v5 }
 0x1f2   : > { %v483_v23 = vpop.f32.mrf.mxu1 }
 0x1f3   : > { %v504_v53 = vmul.f32 2.0, %v483_v23  ;;  %v2147_v23 = vld [vmem:[%s2587_s1 + $0x58] sm:$0xff] }
 0x1f5   : > { %v2090_v7 = vsub.f32 %v504_v53, %v1799_v4  ;;  %v607_v4 = vpack.c.bf16 %v2059_v3, %v2049_v60 }
 0x1fa   : > { %v486_v50 = vpop.f32.mrf.mxu1 }
 0x1fb   : > { %v505_v51 = vmul.f32 2.0, %v486_v50 }
 0x1fd   : > { %v2084_v55 = vsub.f32 %v505_v51, %v1788_v0  ;;  %v610_v0 = vpack.c.bf16 %v2090_v7, %v2095_v58 }
 0x202   : > { %v488_v52 = vpop.f32.mrf.mxu1 }
 0x203   : > { %v506_v15 = vmul.f32 2.0, %v488_v52  ;;  %v2170_v52 = vld [vmem:[%s2587_s1 + $0x70] sm:$0xff] }
 0x205   : > { %v2087_v56 = vsub.f32 %v506_v15, %v1791_v1  ;;  %v609_v1 = vpack.c.bf16 %v2079_v20, %v2074_v14 }
 0x207   : > { %v611_v22 = vpack.c.bf16 %v2087_v56, %v2084_v55 }
 0x209   : > { %v548_v59 = vpop.permute.xlu2 %547  ;;  %612 = vmatpush.bf16.msra.mxu0 %v611_v22  ;;  %1707 = vmatpush.bf16.msra.mxu2 %v611_v22 }
 0x20a   : > { %592 = vst.msk [vmem:[#allocation2 + $0x20] sm:$0xff] %vm587_vm2, %v548_v59  ;;  %839 = vmatpush.bf16.msrb.mxu3 %v611_v22 }
 0x20d   : > { %613 = vmatpush.bf16.msra.mxu0 %v610_v0  ;;  %1708 = vmatpush.bf16.msra.mxu2 %v610_v0 }
 0x20e   : > { %840 = vmatpush.bf16.msrb.mxu3 %v610_v0 }
 0x211   : > { %614 = vmatpush.bf16.msra.mxu0 %v609_v1  ;;  %1709 = vmatpush.bf16.msra.mxu2 %v609_v1 }
 0x212   : > { %841 = vmatpush.bf16.msrb.mxu3 %v609_v1 }
 0x215   : > { %615 = vmatpush.bf16.msra.mxu0 %v608_v2  ;;  %1710 = vmatpush.bf16.msra.mxu2 %v608_v2 }
 0x216   : > { %842 = vmatpush.bf16.msrb.mxu3 %v608_v2 }
 0x219   : > { %616 = vmatpush.bf16.msra.mxu0 %v607_v4  ;;  %1711 = vmatpush.bf16.msra.mxu2 %v607_v4  ;;  %v544_v16 = vpop.permute.xlu2 %543 }
 0x21a   : > { %843 = vmatpush.bf16.msrb.mxu3 %v607_v4  ;;  %590 = vst.msk [vmem:[#allocation2 + $0x10] sm:$0xff] %vm587_vm2, %v544_v16 }
 0x21d   : > { %617 = vmatpush.bf16.msra.mxu0 %v606_v18  ;;  %1712 = vmatpush.bf16.msra.mxu2 %v606_v18 }
 0x21e   : > { %844 = vmatpush.bf16.msrb.mxu3 %v606_v18 }
 0x221   : > { %v552_v63 = vpop.permute.xlu2 %551  ;;  %618 = vmatpush.bf16.msra.mxu0 %v605_v62  ;;  %1713 = vmatpush.bf16.msra.mxu2 %v605_v62 }
 0x222   : > { %594 = vst.msk [vmem:[#allocation2 + $0x30] sm:$0xff] %vm587_vm2, %v552_v63  ;;  %845 = vmatpush.bf16.msrb.mxu3 %v605_v62 }
 0x225   : > { %619 = vmatpush.bf16.msra.mxu0 %v604_v12  ;;  %1714 = vmatpush.bf16.msra.mxu2 %v604_v12 }
 0x226   : > { %846 = vmatpush.bf16.msrb.mxu3 %v604_v12 }
 0x228   : > { %620 = vmatmul.bf16.vlgmr.msra.gmra.mxu0 %v1854_v24  ;;  %630 = vmatmul.bf16.vlgmr.msra.gmra.mxu2 %v1859_v25 }
 0x229   : > { %847 = vmatmul.bf16.vlgmr.msrb.gmra.mxu3 %v2117_v19  ;;  %v550_v11 = vpop.permute.xlu0 %549  ;;  %v556_v13 = vpop.permute.xlu2 %555 }
 0x22a   : > { %593 = vst.msk [vmem:[#allocation2 + $0x28] sm:$0xff] %vm587_vm2, %v550_v11 }
 0x22b   : > { %596 = vst.msk [vmem:[#allocation2 + $0x40] sm:$0xff] %vm587_vm2, %v556_v13 }
 0x238   : > { %625 = vmatmul.bf16.gmra.mxu0 %v1866_v26  ;;  %635 = vmatmul.bf16.gmra.mxu2 %v1871_v27  ;;  %v540_v27 = vpop.permute.xlu1 %539 }
 0x239   : > { %852 = vmatmul.bf16.gmra.mxu3 %v2127_v9  ;;  %v560_v24 = vpop.permute.xlu2 %559  ;;  %v546_v25 = vpop.permute.xlu0 %545  ;;  %588 = vst.msk [vmem:[#allocation2] sm:$0xff] %vm587_vm2, %v540_v27 }
 0x23a   : > { %598 = vst.msk [vmem:[#allocation2 + $0x50] sm:$0xff] %vm587_vm2, %v560_v24 }
 0x23b   : > { %591 = vst.msk [vmem:[#allocation2 + $0x18] sm:$0xff] %vm587_vm2, %v546_v25 }
 0x240   : > { %v542_v51 = vpop.permute.xlu1 %541 }
 0x241   : > { %v554_v17 = vpop.permute.xlu0 %553  ;;  %589 = vst.msk [vmem:[#allocation2 + $0x8] sm:$0xff] %vm587_vm2, %v542_v51 }
 0x242   : > { %595 = vst.msk [vmem:[#allocation2 + $0x38] sm:$0xff] %vm587_vm2, %v554_v17 }
 0x248   : > { %640 = vmatmul.bf16.gmra.mxu2 %v1878_v28  ;;  %v2156_v28 = vld [vmem:[%s2587_s1 + $0x60] sm:$0xff] }
 0x249   : > { %857 = vmatmul.bf16.gmra.mxu3 %v2138_v10  ;;  %v558_v26 = vpop.permute.xlu0 %557 }
 0x24a   : > { %597 = vst.msk [vmem:[#allocation2 + $0x48] sm:$0xff] %vm587_vm2, %v558_v26 }
 0x258   : > { %645 = vmatmul.bf16.gmra.mxu2 %v1884_v29  ;;  %v2163_v29 = vld [vmem:[%s2587_s1 + $0x68] sm:$0xff] }
 0x259   : > { %862 = vmatmul.bf16.gmra.mxu3 %v2147_v23  ;;  %v562_v50 = vpop.permute.xlu0 %561 }
 0x25a   : > { %599 = vst.msk [vmem:[#allocation2 + $0x58] sm:$0xff] %vm587_vm2, %v562_v50 }
 0x268   : > { %650 = vmatmul.bf16.gmra.mxu2 %v1890_v30  ;;  %v2176_v30 = vld [vmem:[%s2587_s1 + $0x78] sm:$0xff] }
 0x269   : > { %867 = vmatmul.bf16.gmra.mxu3 %v2156_v28 }
 0x278   : > { %655 = vmatmul.bf16.gmra.mxu2 %v1896_v31 }
 0x279   : > { %872 = vmatmul.bf16.gmra.mxu3 %v2163_v29 }
 0x289   : > { %877 = vmatmul.bf16.gmra.mxu3 %v2170_v52 }
 0x299   : > { %882 = vmatmul.bf16.gmra.mxu3 %v2176_v30 }
 0x2a5   : > { %v621_v53 = vpop.f32.mrf.mxu0 }
 0x2a6   : > { %v661_v15 = vmul.f32 2.0, %v621_v53 }
 0x2a8   : > { %v677_v31 = vsub.f32 %v661_v15, %v1899_v32 }
 0x2aa   : > { %709 = vrot.lane.b32.xlu2 %v677_v31, %s1740_s6 }
 0x2ab   : > { %v631_v6 = vpop.f32.mrf.mxu2 }
 0x2ac   : > { %v665_v22 = vmul.f32 2.0, %v631_v6  ;;  %v2181_v59 = vpop.f32.mrf.mxu3 }
 0x2ad   : > { %904 = vrot.lane.b32.xlu0 %v2181_v59, %s1741_s7  ;;  %v623_v0 = vpop.f32.mrf.mxu0 }
 0x2ae   : > { %v681_v1 = vsub.f32 %v665_v22, %v1903_v33  ;;  %v662_v2 = vmul.f32 2.0, %v623_v0 }
 0x2b0   : > { %v678_v4 = vsub.f32 %v662_v2, %v1905_v34  ;;  %717 = vrot.lane.b32.xlu1 %v681_v1, %s1740_s6 }
 0x2b2   : > { %711 = vrot.lane.b32.xlu2 %v678_v4, %s1740_s6 }
 0x2b3   : > { %v633_v32 = vpop.f32.mrf.mxu2 }
 0x2b4   : > { %v666_v16 = vmul.f32 2.0, %v633_v32  ;;  %v2189_v18 = vpop.f32.mrf.mxu3 }
 0x2b5   : > { %v626_v62 = vpop.f32.mrf.mxu0 }
 0x2b6   : > { %v682_v63 = vsub.f32 %v666_v16, %v1909_v35  ;;  %v663_v12 = vmul.f32 2.0, %v626_v62 }
 0x2b8   : > { %906 = vrot.lane.b32.xlu1 %v2189_v18, %s1741_s7  ;;  %v679_v13 = vsub.f32 %v663_v12, %v1913_v36 }
 0x2ba   : > { %719 = vrot.lane.b32.xlu2 %v682_v63, %s1740_s6 }
 0x2bb   : > { %v636_v33 = vpop.f32.mrf.mxu2 }
 0x2bc   : > { %v2195_v11 = vpop.f32.mrf.mxu3  ;;  %v667_v35 = vmul.f32 2.0, %v636_v33 }
 0x2bd   : > { %908 = vrot.lane.b32.xlu0 %v2195_v11, %s1741_s7  ;;  %v628_v34 = vpop.f32.mrf.mxu0 }
 0x2be   : > { %v664_v24 = vmul.f32 2.0, %v628_v34  ;;  %v683_v50 = vsub.f32 %v667_v35, %v1917_v37 }
 0x2c0   : > { %v680_v25 = vsub.f32 %v664_v24, %v1919_v38  ;;  %713 = vrot.lane.b32.xlu1 %v679_v13, %s1740_s6 }
 0x2c2   : > { %715 = vrot.lane.b32.xlu2 %v680_v25, %s1740_s6 }
 0x2c3   : > { %v638_v17 = vpop.f32.mrf.mxu2 }
 0x2c4   : > { %v668_v26 = vmul.f32 2.0, %v638_v17  ;;  %v2203_v27 = vpop.f32.mrf.mxu3 }
 0x2c6   : > { %v684_v51 = vsub.f32 %v668_v26, %v1925_v39 }
 0x2c8   : > { %721 = vrot.lane.b32.xlu1 %v683_v50, %s1740_s6 }
 0x2ca   : > { %723 = vrot.lane.b32.xlu2 %v684_v51, %s1740_s6 }
 0x2cb   : > { %v641_v36 = vpop.f32.mrf.mxu2 }
 0x2cc   : > { %v2209_v53 = vpop.f32.mrf.mxu3  ;;  %v669_v38 = vmul.f32 2.0, %v641_v36 }
 0x2cd   : > { %912 = vrot.lane.b32.xlu0 %v2209_v53, %s1741_s7 }
 0x2ce   : > { %v685_v37 = vsub.f32 %v669_v38, %v1931_v40 }
 0x2d0   : > { %910 = vrot.lane.b32.xlu1 %v2203_v27, %s1741_s7 }
 0x2d3   : > { %v643_v15 = vpop.f32.mrf.mxu2 }
 0x2d4   : > { %v670_v31 = vmul.f32 2.0, %v643_v15  ;;  %v2215_v6 = vpop.f32.mrf.mxu3 }
 0x2d6   : > { %v686_v39 = vsub.f32 %v670_v31, %v1935_v41 }
 0x2d8   : > { %725 = vrot.lane.b32.xlu1 %v685_v37, %s1740_s6  ;;  %727 = vrot.lane.b32.xlu2 %v686_v39, %s1740_s6 }
 0x2db   : > { %v646_v22 = vpop.f32.mrf.mxu2 }
 0x2dc   : > { %v2221_v0 = vpop.f32.mrf.mxu3  ;;  %v671_v1 = vmul.f32 2.0, %v646_v22 }
 0x2dd   : > { %916 = vrot.lane.b32.xlu0 %v2221_v0, %s1741_s7 }
 0x2de   : > { %v687_v40 = vsub.f32 %v671_v1, %v1939_v42 }
 0x2e0   : > { %914 = vrot.lane.b32.xlu1 %v2215_v6, %s1741_s7 }
 0x2e3   : > { %v648_v2 = vpop.f32.mrf.mxu2 }
 0x2e4   : > { %v672_v4 = vmul.f32 2.0, %v648_v2  ;;  %v2227_v32 = vpop.f32.mrf.mxu3  ;;  %v971_v2 = vpack.c.bf16 %v2215_v6, %v2209_v53 }
 0x2e5   : > { %v972_v1 = vpack.c.bf16 %v2227_v32, %v2221_v0 }
 0x2e6   : > { %v688_v41 = vsub.f32 %v672_v4, %v1943_v43 }
 0x2e8   : > { %729 = vrot.lane.b32.xlu1 %v687_v40, %s1740_s6  ;;  %731 = vrot.lane.b32.xlu2 %v688_v41, %s1740_s6  ;;  %v970_v40 = vpack.c.bf16 %v2203_v27, %v2195_v11 }
 0x2ec   : > { %v2233_v16 = vpop.f32.mrf.mxu3 }
 0x2ed   : > { %920 = vrot.lane.b32.xlu0 %v2233_v16, %s1741_s7 }
 0x2f0   : > { %918 = vrot.lane.b32.xlu1 %v2227_v32, %s1741_s7 }
 0x2f4   : > { %v2239_v62 = vpop.f32.mrf.mxu3 }
 0x2f5   : > { %v973_v31 = vpack.c.bf16 %v2239_v62, %v2233_v16 }
 0x2f8   : > { %922 = vrot.lane.b32.xlu1 %v2239_v62, %s1741_s7 }
 0x2fc   : > { %v2243_v42 = vpop.f32.mrf.mxu3 }
 0x304   : > { %v2245_v43 = vpop.f32.mrf.mxu3  ;;  %v710_v63 = vpop.permute.xlu2 %709 }
 0x305   : > { %758 = vst.msk [vmem:[#allocation2] sm:$0xff] %vm757_vm3, %v710_v63  ;;  %v974_v15 = vpack.c.bf16 %v2245_v43, %v2243_v42  ;;  %v969_v63 = vpack.c.bf16 %v2189_v18, %v2181_v59 }
 0x30c   : > { %v2248_v12 = vpop.f32.mrf.mxu3  ;;  %v712_v33 = vpop.permute.xlu2 %711 }
 0x30d   : > { %759 = vst.msk [vmem:[#allocation2 + $0x8] sm:$0xff] %vm757_vm3, %v712_v33 }
 0x314   : > { %v2251_v34 = vpop.f32.mrf.mxu3  ;;  %v720_v13 = vpop.permute.xlu2 %719 }
 0x315   : > { %763 = vst.msk [vmem:[#allocation2 + $0x28] sm:$0xff] %vm757_vm3, %v720_v13  ;;  %v975_v36 = vpack.c.bf16 %v2251_v34, %v2248_v12 }
 0x31c   : > { %v2254_v24 = vpop.f32.mrf.mxu3  ;;  %v716_v25 = vpop.permute.xlu2 %715 }
 0x31d   : > { %761 = vst.msk [vmem:[#allocation2 + $0x18] sm:$0xff] %vm757_vm3, %v716_v25 }
 0x31f   : > { %v905_v35 = vpop.permute.xlu0 %904 }
 0x320   : > { %953 = vst.msk [vmem:[#allocation2] sm:$0xff] %vm952_vm4, %v905_v35 }
 0x322   : > { %v718_v17 = vpop.permute.xlu1 %717 }
 0x323   : > { %762 = vst.msk [vmem:[#allocation2 + $0x20] sm:$0xff] %vm757_vm3, %v718_v17 }
 0x324   : > { %v2259_v26 = vpop.f32.mrf.mxu3  ;;  %v724_v50 = vpop.permute.xlu2 %723 }
 0x325   : > { %v976_v51 = vpack.c.bf16 %v2259_v26, %v2254_v24  ;;  %765 = vst.msk [vmem:[#allocation2 + $0x38] sm:$0xff] %vm757_vm3, %v724_v50 }
 0x327   : > { %977 = vmatpush.bf16.msrb.mxu0 %v976_v51 }
 0x32a   : > { %v907_v38 = vpop.permute.xlu1 %906 }
 0x32b   : > { %954 = vst.msk [vmem:[#allocation2 + $0x8] sm:$0xff] %vm952_vm4, %v907_v38  ;;  %978 = vmatpush.bf16.msrb.mxu0 %v975_v36 }
 0x32f   : > { %979 = vmatpush.bf16.msrb.mxu0 %v974_v15  ;;  %v909_v22 = vpop.permute.xlu0 %908 }
 0x332   : > { %v714_v37 = vpop.permute.xlu1 %713  ;;  %v728_v39 = vpop.permute.xlu2 %727 }
 0x333   : > { %980 = vmatpush.bf16.msrb.mxu0 %v973_v31  ;;  %760 = vst.msk [vmem:[#allocation2 + $0x10] sm:$0xff] %vm757_vm3, %v714_v37 }
 0x334   : > { %955 = vst.msk [vmem:[#allocation2 + $0x10] sm:$0xff] %vm952_vm4, %v909_v22 }
 0x335   : > { %767 = vst.msk [vmem:[#allocation2 + $0x48] sm:$0xff] %vm757_vm3, %v728_v39 }
 0x337   : > { %981 = vmatpush.bf16.msrb.mxu0 %v972_v1 }
 0x33a   : > { %v722_v4 = vpop.permute.xlu1 %721 }
 0x33b   : > { %982 = vmatpush.bf16.msrb.mxu0 %v971_v2  ;;  %764 = vst.msk [vmem:[#allocation2 + $0x30] sm:$0xff] %vm757_vm3, %v722_v4 }
 0x33f   : > { %v913_v41 = vpop.permute.xlu0 %912  ;;  %983 = vmatpush.bf16.msrb.mxu0 %v970_v40 }
 0x340   : > { %957 = vst.msk [vmem:[#allocation2 + $0x20] sm:$0xff] %vm952_vm4, %v913_v41 }
 0x342   : > { %v911_v33 = vpop.permute.xlu1 %910  ;;  %v732_v13 = vpop.permute.xlu2 %731 }
 0x343   : > { %984 = vmatpush.bf16.msrb.mxu0 %v969_v63  ;;  %956 = vst.msk [vmem:[#allocation2 + $0x18] sm:$0xff] %vm952_vm4, %v911_v33 }
 0x344   : > { %769 = vst.msk [vmem:[#allocation2 + $0x58] sm:$0xff] %vm757_vm3, %v732_v13 }
 0x346   : > { %985 = vmatmul.bf16.vlgmr.msrb.gmra.mxu0 %v2117_v19 }
 0x34a   : > { %v726_v25 = vpop.permute.xlu1 %725 }
 0x34b   : > { %766 = vst.msk [vmem:[#allocation2 + $0x40] sm:$0xff] %vm757_vm3, %v726_v25 }
 0x34f   : > { %v917_v35 = vpop.permute.xlu0 %916 }
 0x350   : > { %959 = vst.msk [vmem:[#allocation2 + $0x30] sm:$0xff] %vm952_vm4, %v917_v35 }
 0x352   : > { %v915_v17 = vpop.permute.xlu1 %914 }
 0x353   : > { %958 = vst.msk [vmem:[#allocation2 + $0x28] sm:$0xff] %vm952_vm4, %v915_v17 }
 0x356   : > { %990 = vmatmul.bf16.gmra.mxu0 %v2127_v9 }
 0x35a   : > { %v730_v50 = vpop.permute.xlu1 %729 }
 0x35b   : > { %768 = vst.msk [vmem:[#allocation2 + $0x50] sm:$0xff] %vm757_vm3, %v730_v50 }
 0x35f   : > { %v921_v51 = vpop.permute.xlu0 %920 }
 0x360   : > { %961 = vst.msk [vmem:[#allocation2 + $0x40] sm:$0xff] %vm952_vm4, %v921_v51 }
 0x362   : > { %v919_v36 = vpop.permute.xlu1 %918 }
 0x363   : > { %960 = vst.msk [vmem:[#allocation2 + $0x38] sm:$0xff] %vm952_vm4, %v919_v36 }
 0x366   : > { %995 = vmatmul.bf16.gmra.mxu0 %v2138_v10 }
 0x36a   : > { %v923_v38 = vpop.permute.xlu1 %922 }
 0x36b   : > { %962 = vst.msk [vmem:[#allocation2 + $0x48] sm:$0xff] %vm952_vm4, %v923_v38 }
 0x376   : > { %1000 = vmatmul.bf16.gmra.mxu0 %v2147_v23 }
 0x386   : > { %1005 = vmatmul.bf16.gmra.mxu0 %v2156_v28 }
 0x396   : > { %1010 = vmatmul.bf16.gmra.mxu0 %v2163_v29 }
 0x3a6   : > { %1015 = vmatmul.bf16.gmra.mxu0 %v2170_v52 }
 0x3b6   : > { %1020 = vmatmul.bf16.gmra.mxu0 %v2176_v30 }
 0x3c3   : > { %v986_v15 = vpop.f32.mrf.mxu0 }
 0x3c4   : > { %v1026_v31 = vmul.f32 2.0, %v986_v15 }
 0x3c6   : > { %v2302_v37 = vsub.f32 %v1026_v31, %v2024_v48 }
 0x3c8   : > { %1074 = vrot.lane.b32.xlu2 %v2302_v37, %s1742_s8 }
 0x3cb   : > { %v988_v39 = vpop.f32.mrf.mxu0 }
 0x3cc   : > { %v1027_v22 = vmul.f32 2.0, %v988_v39 }
 0x3ce   : > { %v2307_v1 = vsub.f32 %v1027_v22, %v2034_v54 }
 0x3d0   : > { %1076 = vrot.lane.b32.xlu0 %v2307_v1, %s1742_s8  ;;  %v1139_v2 = vpack.c.bf16 %v2307_v1, %v2302_v37 }
 0x3d3   : > { %v991_v4 = vpop.f32.mrf.mxu0 }
 0x3d4   : > { %v1028_v40 = vmul.f32 2.0, %v991_v4 }
 0x3d6   : > { %v2314_v48 = vsub.f32 %v1028_v40, %v2044_v57 }
 0x3d8   : > { %924 = vrot.lane.b32.xlu0 %v2243_v42, %s1741_s7  ;;  %1078 = vrot.lane.b32.xlu2 %v2314_v48, %s1742_s8 }
 0x3db   : > { %v993_v41 = vpop.f32.mrf.mxu0 }
 0x3dc   : > { %v1029_v54 = vmul.f32 2.0, %v993_v41 }
 0x3de   : > { %v2321_v63 = vsub.f32 %v1029_v54, %v2052_v61 }
 0x3e0   : > { %1080 = vrot.lane.b32.xlu0 %v2321_v63, %s1742_s8  ;;  %v1140_v33 = vpack.c.bf16 %v2321_v63, %v2314_v48 }
 0x3e3   : > { %v996_v13 = vpop.f32.mrf.mxu0 }
 0x3e4   : > { %v1030_v57 = vmul.f32 2.0, %v996_v13 }
 0x3e6   : > { %v2328_v25 = vsub.f32 %v1030_v57, %v2027_v49 }
 0x3e8   : > { %1082 = vrot.lane.b32.xlu2 %v2328_v25, %s1742_s8 }
 0x3eb   : > { %v998_v35 = vpop.f32.mrf.mxu0 }
 0x3ec   : > { %v1031_v17 = vmul.f32 2.0, %v998_v35 }
 0x3ee   : > { %v2333_v50 = vsub.f32 %v1031_v17, %v2037_v21 }
 0x3f0   : > { %1084 = vrot.lane.b32.xlu0 %v2333_v50, %s1742_s8  ;;  %v1141_v61 = vpack.c.bf16 %v2333_v50, %v2328_v25 }
 0x3f3   : > { %v1001_v51 = vpop.f32.mrf.mxu0 }
 0x3f4   : > { %v1032_v36 = vmul.f32 2.0, %v1001_v51 }
 0x3f6   : > { %v1048_v38 = vsub.f32 %v1032_v36, %v2049_v60 }
 0x3f8   : > { %1086 = vrot.lane.b32.xlu2 %v1048_v38, %s1742_s8 }
 0x3fb   : > { %v1003_v49 = vpop.f32.mrf.mxu0 }
 0x3fc   : > { %v1033_v15 = vmul.f32 2.0, %v1003_v49 }
 0x3fe   : > { %v1049_v31 = vsub.f32 %v1033_v15, %v2059_v3 }
 0x400   : > { %1088 = vrot.lane.b32.xlu0 %v1049_v31, %s1742_s8  ;;  %v1142_v21 = vpack.c.bf16 %v1049_v31, %v1048_v38 }
 0x403   : > { %v1006_v39 = vpop.f32.mrf.mxu0 }
 0x404   : > { %v1034_v22 = vmul.f32 2.0, %v1006_v39 }
 0x406   : > { %v1050_v4 = vsub.f32 %v1034_v22, %v2062_v5 }
 0x408   : > { %1090 = vrot.lane.b32.xlu2 %v1050_v4, %s1742_s8 }
 0x40b   : > { %v1008_v40 = vpop.f32.mrf.mxu0 }
 0x40c   : > { %v1035_v41 = vmul.f32 2.0, %v1008_v40 }
 0x40e   : > { %v1051_v54 = vsub.f32 %v1035_v41, %v2069_v8 }
 0x410   : > { %1092 = vrot.lane.b32.xlu0 %v1051_v54, %s1742_s8 }
 0x413   : > { %v1011_v60 = vpop.f32.mrf.mxu0 }
 0x414   : > { %v1036_v41 = vmul.f32 2.0, %v1011_v60 }
 0x41b   : > { %v1013_v13 = vpop.f32.mrf.mxu0 }
 0x41c   : > { %v1037_v57 = vmul.f32 2.0, %v1013_v13 }
 0x41e   : > { %v1053_v3 = vsub.f32 %v1037_v57, %v2079_v20 }
 0x420   : > { %1096 = vrot.lane.b32.xlu0 %v1053_v3, %s1742_s8 }
 0x422   : > { %v1075_v35 = vpop.permute.xlu2 %1074 }
 0x423   : > { %1123 = vst.msk [vmem:[#allocation2] sm:$0xff] %vm1122_vm5, %v1075_v35  ;;  %v1016_v5 = vpop.f32.mrf.mxu0 }
 0x424   : > { %v1038_v15 = vmul.f32 2.0, %v1016_v5  ;;  %v1052_v5 = vsub.f32 %v1036_v41, %v2074_v14 }
 0x426   : > { %v2365_v13 = vsub.f32 %v1038_v15, %v2095_v58 }
 0x428   : > { %393 = vrot.lane.b32.xlu0 %v1947_v44, %s1738_s11 }
 0x42b   : > { %v1018_v17 = vpop.f32.mrf.mxu0 }
 0x42c   : > { %v1039_v20 = vmul.f32 2.0, %v1018_v17  ;;  %v1144_v17 = vpack.c.bf16 %v1053_v3, %v1052_v5  ;;  %v651_v3 = vpop.f32.mrf.mxu2 }
 0x42e   : > { %v1055_v31 = vsub.f32 %v1039_v20, %v2090_v7 }
 0x430   : > { %565 = vrot.lane.b32.xlu0 %v2090_v7, %s1739_s12  ;;  %v1145_v7 = vpack.c.bf16 %v1055_v31, %v2365_v13 }
 0x432   : > { %v1079_v8 = vpop.permute.xlu2 %1078 }
 0x433   : > { %1125 = vst.msk [vmem:[#allocation2 + $0x10] sm:$0xff] %vm1122_vm5, %v1079_v8  ;;  %v1021_v51 = vpop.f32.mrf.mxu0  ;;  %v1143_v8 = vpack.c.bf16 %v1051_v54, %v1050_v4 }
 0x434   : > { %v1040_v36 = vmul.f32 2.0, %v1021_v51 }
 0x436   : > { %v2359_v39 = vsub.f32 %v1040_v36, %v2084_v55 }
 0x438   : > { %928 = vrot.lane.b32.xlu0 %v2248_v12, %s1741_s7 }
 0x43b   : > { %v1023_v38 = vpop.f32.mrf.mxu0 }
 0x43c   : > { %v1041_v49 = vmul.f32 2.0, %v1023_v38 }
 0x43e   : > { %v1057_v22 = vsub.f32 %v1041_v49, %v2087_v56 }
 0x440   : > { %1100 = vrot.lane.b32.xlu0 %v1055_v31, %s1742_s8  ;;  %v1146_v40 = vpack.c.bf16 %v1057_v22, %v2359_v39  ;;  %v653_v31 = vpop.f32.mrf.mxu2 }
 0x442   : > { %v1077_v57 = vpop.permute.xlu0 %1076  ;;  %1147 = vmatpush.bf16.msrb.mxu1 %v1146_v40  ;;  %v1083_v35 = vpop.permute.xlu2 %1082 }
 0x443   : > { %1124 = vst.msk [vmem:[#allocation2 + $0x8] sm:$0xff] %vm1122_vm5, %v1077_v57 }
 0x444   : > { %1127 = vst.msk [vmem:[#allocation2 + $0x20] sm:$0xff] %vm1122_vm5, %v1083_v35 }
 0x446   : > { %1148 = vmatpush.bf16.msrb.mxu1 %v1145_v7 }
 0x448   : > { %397 = vrot.lane.b32.xlu0 %v1959_v46, %s1738_s11 }
 0x44a   : > { %v925_v60 = vpop.permute.xlu0 %924  ;;  %1149 = vmatpush.bf16.msrb.mxu1 %v1144_v17  ;;  %v1689_v17 = vld [vmem:[%s2588_s2 + $0x28] sm:$0xff] }
 0x44b   : > { %963 = vst.msk [vmem:[#allocation2 + $0x50] sm:$0xff] %vm952_vm4, %v925_v60 }
 0x44e   : > { %1150 = vmatpush.bf16.msrb.mxu1 %v1143_v8 }
 0x450   : > { %569 = vrot.lane.b32.xlu0 %v2087_v56, %s1739_s12 }
 0x452   : > { %v1081_v51 = vpop.permute.xlu0 %1080  ;;  %1151 = vmatpush.bf16.msrb.mxu1 %v1142_v21  ;;  %v1087_v20 = vpop.permute.xlu2 %1086 }
 0x453   : > { %1126 = vst.msk [vmem:[#allocation2 + $0x18] sm:$0xff] %vm1122_vm5, %v1081_v51  ;;  %v656_v51 = vpop.f32.mrf.mxu2 }
 0x454   : > { %1129 = vst.msk [vmem:[#allocation2 + $0x30] sm:$0xff] %vm1122_vm5, %v1087_v20  ;;  %v1687_v20 = vld [vmem:[%s2588_s2 + $0x18] sm:$0xff] }
 0x456   : > { %1152 = vmatpush.bf16.msrb.mxu1 %v1141_v61 }
 0x458   : > { %932 = vrot.lane.b32.xlu0 %v2254_v24, %s1741_s7 }
 0x45a   : > { %1153 = vmatpush.bf16.msrb.mxu1 %v1140_v33 }
 0x45e   : > { %1154 = vmatpush.bf16.msrb.mxu1 %v1139_v2 }
 0x460   : > { %1104 = vrot.lane.b32.xlu0 %v1057_v22, %s1742_s8  ;;  %v674_v22 = vmul.f32 2.0, %v653_v31 }
 0x461   : > { %1155 = vmatmul.bf16.vlgmr.msrb.gmra.mxu1 %v2117_v19 }
 0x462   : > { %v1085_v14 = vpop.permute.xlu0 %1084  ;;  %v1091_v56 = vpop.permute.xlu2 %1090  ;;  %v690_v41 = vsub.f32 %v674_v22, %v1949_v45 }
 0x463   : > { %1128 = vst.msk [vmem:[#allocation2 + $0x28] sm:$0xff] %vm1122_vm5, %v1085_v14  ;;  %v1686_v14 = vld [vmem:[%s2588_s2 + $0x10] sm:$0xff] }
 0x464   : > { %1131 = vst.msk [vmem:[#allocation2 + $0x40] sm:$0xff] %vm1122_vm5, %v1091_v56  ;;  %v675_v56 = vmul.f32 2.0, %v656_v51 }
 0x471   : > { %1160 = vmatmul.bf16.gmra.mxu1 %v2127_v9 }
 0x472   : > { %v1089_v25 = vpop.permute.xlu0 %1088 }
 0x473   : > { %1130 = vst.msk [vmem:[#allocation2 + $0x38] sm:$0xff] %vm1122_vm5, %v1089_v25 }
 0x481   : > { %1165 = vmatmul.bf16.gmra.mxu1 %v2138_v10 }
 0x482   : > { %v1093_v48 = vpop.permute.xlu0 %1092 }
 0x483   : > { %1132 = vst.msk [vmem:[#allocation2 + $0x48] sm:$0xff] %vm1122_vm5, %v1093_v48 }
 0x491   : > { %1170 = vmatmul.bf16.gmra.mxu1 %v2147_v23 }
 0x492   : > { %v2398_v37 = vpop.permute.xlu0 %1096 }
 0x49a   : > { %v394_v19 = vpop.permute.xlu0 %393 }
 0x49b   : > { %430 = vst.msk [vmem:[#allocation2 + $0x60] sm:$0xff] %vm417_vm1, %v394_v19  ;;  %v1685_v19 = vld [vmem:[%s2588_s2 + $0x8] sm:$0xff] }
 0x4a1   : > { %1175 = vmatmul.bf16.gmra.mxu1 %v2156_v28 }
 0x4a2   : > { %v2402_v1 = vpop.permute.xlu0 %565 }
 0x4aa   : > { %v2404_v9 = vpop.permute.xlu0 %928 }
 0x4b1   : > { %1180 = vmatmul.bf16.gmra.mxu1 %v2163_v29 }
 0x4b2   : > { %v2407_v2 = vpop.permute.xlu0 %1100 }
 0x4ba   : > { %v398_v10 = vpop.permute.xlu0 %397 }
 0x4bb   : > { %432 = vst.msk [vmem:[#allocation2 + $0x70] sm:$0xff] %vm417_vm1, %v398_v10 }
 0x4c1   : > { %1185 = vmatmul.bf16.gmra.mxu1 %v2170_v52 }
 0x4d1   : > { %1190 = vmatmul.bf16.gmra.mxu1 %v2176_v30 }
 0x4de   : > { %v1156_v23 = vpop.f32.mrf.mxu1 }
 0x4df   : > { %v1196_v63 = vmul.f32 2.0, %v1156_v23  ;;  %v658_v23 = vpop.f32.mrf.mxu2 }
 0x4e1   : > { %v1212_v33 = vsub.f32 %v1196_v63, %v2181_v59  ;;  %v676_v63 = vmul.f32 2.0, %v658_v23 }
 0x4e3   : > { %1244 = vrot.lane.b32.xlu1 %v1212_v33, %s1743_s9 }
 0x4e6   : > { %v1158_v28 = vpop.f32.mrf.mxu1 }
 0x4e7   : > { %v1197_v50 = vmul.f32 2.0, %v1158_v28 }
 0x4e9   : > { %v1213_v29 = vsub.f32 %v1197_v50, %v2189_v18  ;;  %v692_v50 = vsub.f32 %v676_v63, %v1977_v47 }
 0x4eb   : > { %926 = vrot.lane.b32.xlu1 %v2245_v43, %s1741_s7  ;;  %1246 = vrot.lane.b32.xlu2 %v1213_v29, %s1743_s9 }
 0x4ee   : > { %v1161_v61 = vpop.f32.mrf.mxu1 }
 0x4ef   : > { %v1198_v52 = vmul.f32 2.0, %v1161_v61 }
 0x4f1   : > { %v1214_v30 = vsub.f32 %v1198_v52, %v2195_v11  ;;  %v673_v11 = vmul.f32 2.0, %v651_v3 }
 0x4f3   : > { %1248 = vrot.lane.b32.xlu1 %v1214_v30, %s1743_s9  ;;  %1094 = vrot.lane.b32.xlu2 %v1052_v5, %s1742_s8 }
 0x4f6   : > { %v1163_v59 = vpop.f32.mrf.mxu1 }
 0x4f7   : > { %v1199_v21 = vmul.f32 2.0, %v1163_v59 }
 0x4f9   : > { %v1215_v4 = vsub.f32 %v1199_v21, %v2203_v27  ;;  %v689_v27 = vsub.f32 %v673_v11, %v1947_v44 }
 0x4fb   : > { %395 = vrot.lane.b32.xlu1 %v1949_v45, %s1738_s11  ;;  %1250 = vrot.lane.b32.xlu2 %v1215_v4, %s1743_s9  ;;  %v1690_v45 = vld [vmem:[%s2588_s2 + $0x30] sm:$0xff] }
 0x4fc   : > { %1419 = vmatpush.bf16.msrb.mxu2 %v1690_v45 }
 0x4fe   : > { %v1166_v18 = vpop.f32.mrf.mxu1 }
 0x4ff   : > { %v1200_v54 = vmul.f32 2.0, %v1166_v18 }
 0x500   : > { %1420 = vmatpush.bf16.msrb.mxu2 %v1689_v17 }
 0x501   : > { %v1216_v36 = vsub.f32 %v1200_v54, %v2209_v53 }
 0x503   : > { %1252 = vrot.lane.b32.xlu1 %v1216_v36, %s1743_s9  ;;  %563 = vrot.lane.b32.xlu2 %v2095_v58, %s1739_s12 }
 0x506   : > { %v1168_v38 = vpop.f32.mrf.mxu1 }
 0x507   : > { %v1201_v49 = vmul.f32 2.0, %v1168_v38 }
 0x509   : > { %v1217_v15 = vsub.f32 %v1201_v49, %v2215_v6 }
 0x50b   : > { %733 = vrot.lane.b32.xlu1 %v689_v27, %s1740_s6  ;;  %1254 = vrot.lane.b32.xlu2 %v1217_v15, %s1743_s9 }
 0x50e   : > { %v1171_v40 = vpop.f32.mrf.mxu1 }
 0x50f   : > { %v1202_v53 = vmul.f32 2.0, %v1171_v40 }
 0x511   : > { %v1218_v57 = vsub.f32 %v1202_v53, %v2221_v0 }
 0x513   : > { %1256 = vrot.lane.b32.xlu1 %v1218_v57, %s1743_s9  ;;  %735 = vrot.lane.b32.xlu2 %v690_v41, %s1740_s6 }
 0x516   : > { %v1173_v58 = vpop.f32.mrf.mxu1 }
 0x517   : > { %v1203_v44 = vmul.f32 2.0, %v1173_v58 }
 0x519   : > { %v1219_v6 = vsub.f32 %v1203_v44, %v2227_v32 }
 0x51b   : > { %930 = vrot.lane.b32.xlu1 %v2251_v34, %s1741_s7  ;;  %1258 = vrot.lane.b32.xlu2 %v1219_v6, %s1743_s9 }
 0x51e   : > { %v1176_v35 = vpop.f32.mrf.mxu1 }
 0x51f   : > { %v1204_v7 = vmul.f32 2.0, %v1176_v35 }
 0x521   : > { %v1220_v5 = vsub.f32 %v1204_v7, %v2233_v16  ;;  %v1688_v16 = vld [vmem:[%s2588_s2 + $0x20] sm:$0xff] }
 0x522   : > { %1421 = vmatpush.bf16.msrb.mxu2 %v1688_v16 }
 0x523   : > { %1260 = vrot.lane.b32.xlu1 %v1220_v5, %s1743_s9  ;;  %1098 = vrot.lane.b32.xlu2 %v2365_v13, %s1742_s8 }
 0x526   : > { %v1178_v0 = vpop.f32.mrf.mxu1  ;;  %1422 = vmatpush.bf16.msrb.mxu2 %v1687_v20 }
 0x527   : > { %v1205_v32 = vmul.f32 2.0, %v1178_v0 }
 0x529   : > { %v1221_v60 = vsub.f32 %v1205_v32, %v2239_v62 }
 0x52a   : > { %1423 = vmatpush.bf16.msrb.mxu2 %v1686_v14 }
 0x52b   : > { %399 = vrot.lane.b32.xlu1 %v1977_v47, %s1738_s11  ;;  %1262 = vrot.lane.b32.xlu2 %v1221_v60, %s1743_s9 }
 0x52e   : > { %v1181_v13 = vpop.f32.mrf.mxu1  ;;  %1424 = vmatpush.bf16.msrb.mxu2 %v1685_v19 }
 0x52f   : > { %v1206_v8 = vmul.f32 2.0, %v1181_v13 }
 0x531   : > { %v1222_v62 = vsub.f32 %v1206_v8, %v2243_v42  ;;  %v691_v42 = vsub.f32 %v675_v56, %v1959_v46  ;;  %v570_v8 = vpop.permute.xlu0 %569 }
 0x533   : > { %1264 = vrot.lane.b32.xlu1 %v1222_v62, %s1743_s9  ;;  %567 = vrot.lane.b32.xlu2 %v2084_v55, %s1739_s12  ;;  %v1684_v55 = vld [vmem:[%s2588_s2] sm:$0xff] }
 0x534   : > { %1425 = vmatpush.bf16.msrb.mxu2 %v1684_v55 }
 0x536   : > { %v1183_v25 = vpop.f32.mrf.mxu1 }
 0x537   : > { %v1207_v48 = vmul.f32 2.0, %v1183_v25 }
 0x539   : > { %v1223_v10 = vsub.f32 %v1207_v48, %v2245_v43  ;;  %v933_v25 = vpop.permute.xlu0 %932 }
 0x53b   : > { %737 = vrot.lane.b32.xlu1 %v691_v42, %s1740_s6  ;;  %1266 = vrot.lane.b32.xlu2 %v1223_v10, %s1743_s9 }
 0x53e   : > { %v1186_v33 = vpop.f32.mrf.mxu1 }
 0x53f   : > { %v1208_v28 = vmul.f32 2.0, %v1186_v33 }
 0x541   : > { %v1224_v46 = vsub.f32 %v1208_v28, %v2248_v12  ;;  %v1105_v63 = vpop.permute.xlu0 %1104 }
 0x543   : > { %1268 = vrot.lane.b32.xlu1 %v1224_v46, %s1743_s9  ;;  %739 = vrot.lane.b32.xlu2 %v692_v50, %s1740_s6 }
 0x545   : > { %v1247_v43 = vpop.permute.xlu2 %1246 }
 0x546   : > { %1294 = vst.msk [vmem:[#allocation2 + $0x8] sm:$0xff] %vm1292_vm6, %v1247_v43  ;;  %v1188_v29 = vpop.f32.mrf.mxu1 }
 0x547   : > { %v1209_v61 = vmul.f32 2.0, %v1188_v29 }
 0x549   : > { %v1225_v52 = vsub.f32 %v1209_v61, %v2251_v34  ;;  %v1729_v61 = vld [vmem:[%s2589_s3] ss:$0 sm:$0xff] }
 0x54b   : > { %934 = vrot.lane.b32.xlu1 %v2259_v26, %s1741_s7  ;;  %1270 = vrot.lane.b32.xlu2 %v1225_v52, %s1743_s9 }
 0x54d   : > { %v1095_v47 = vpop.permute.xlu2 %1094  ;;  %v1310_v11 = vld [vmem:[#allocation2 + $0x8] sm:$0xff] }
 0x54e   : > { %1133 = vst.msk [vmem:[#allocation2 + $0x50] sm:$0xff] %vm1122_vm5, %v1095_v47  ;;  %v1191_v12 = vpop.f32.mrf.mxu1 }
 0x54f   : > { %v1210_v30 = vmul.f32 2.0, %v1191_v12 }
 0x551   : > { %v1226_v59 = vsub.f32 %v1210_v30, %v2254_v24 }
 0x553   : > { %1272 = vrot.lane.b32.xlu1 %v1226_v59, %s1743_s9  ;;  %1102 = vrot.lane.b32.xlu2 %v2359_v39, %s1742_s8 }
 0x555   : > { %v1245_v21 = vpop.permute.xlu1 %1244  ;;  %v1251_v4 = vpop.permute.xlu2 %1250 }
 0x556   : > { %1293 = vst.msk [vmem:[#allocation2] sm:$0xff] %vm1292_vm6, %v1245_v21  ;;  %v1193_v34 = vpop.f32.mrf.mxu1 }
 0x557   : > { %1296 = vst.msk [vmem:[#allocation2 + $0x18] sm:$0xff] %vm1292_vm6, %v1251_v4  ;;  %v1211_v18 = vmul.f32 2.0, %v1193_v34 }
 0x559   : > { %v1227_v54 = vsub.f32 %v1211_v18, %v2259_v26 }
 0x55b   : > { %1274 = vrot.lane.b32.xlu2 %v1227_v54, %s1743_s9 }
 0x55d   : > { %v927_v3 = vpop.permute.xlu1 %926  ;;  %v564_v36 = vpop.permute.xlu2 %563  ;;  %v1309_v24 = vld [vmem:[#allocation2] sm:$0xff] }
 0x55e   : > { %964 = vst.msk [vmem:[#allocation2 + $0x58] sm:$0xff] %vm952_vm4, %v927_v3  ;;  %v1325_v39 = vpack.c.bf16 %v1310_v11, %v1309_v24  ;;  %v1312_v31 = vld [vmem:[#allocation2 + $0x18] sm:$0xff] }
 0x55f   : > { %1134 = vst.msk [vmem:[#allocation2 + $0x58] sm:$0xff] %vm1122_vm5, %v2398_v37 }
 0x560   : > { %600 = vst.msk [vmem:[#allocation2 + $0x60] sm:$0xff] %vm587_vm2, %v564_v36  ;;  %1656 = vmatmul.msk.bf16.vlgmr.msrb.gmra.mxu2 %vm1393_vm7, %v1325_v39 }
 0x565   : > { %v1249_v38 = vpop.permute.xlu1 %1248  ;;  %v1255_v49 = vpop.permute.xlu2 %1254 }
 0x566   : > { %1295 = vst.msk [vmem:[#allocation2 + $0x10] sm:$0xff] %vm1292_vm6, %v1249_v38 }
 0x567   : > { %1298 = vst.msk [vmem:[#allocation2 + $0x28] sm:$0xff] %vm1292_vm6, %v1255_v49 }
 0x56d   : > { %v396_v26 = vpop.permute.xlu1 %395  ;;  %v736_v27 = vpop.permute.xlu2 %735  ;;  %v1311_v15 = vld [vmem:[#allocation2 + $0x10] sm:$0xff] }
 0x56e   : > { %431 = vst.msk [vmem:[#allocation2 + $0x68] sm:$0xff] %vm417_vm1, %v396_v26  ;;  %v1326_v22 = vpack.c.bf16 %v1312_v31, %v1311_v15  ;;  %v1314_v58 = vld [vmem:[#allocation2 + $0x28] sm:$0xff] }
 0x56f   : > { %601 = vst.msk [vmem:[#allocation2 + $0x68] sm:$0xff] %vm587_vm2, %v2402_v1 }
 0x570   : > { %771 = vst.msk [vmem:[#allocation2 + $0x68] sm:$0xff] %vm757_vm3, %v736_v27  ;;  %1657 = vmatmul.msk.bf16.gmra.mxu2 %vm1393_vm7, %v1326_v22 }
 0x575   : > { %v1253_v37 = vpop.permute.xlu1 %1252  ;;  %v1259_v40 = vpop.permute.xlu2 %1258 }
 0x576   : > { %1297 = vst.msk [vmem:[#allocation2 + $0x20] sm:$0xff] %vm1292_vm6, %v1253_v37 }
 0x577   : > { %1300 = vst.msk [vmem:[#allocation2 + $0x38] sm:$0xff] %vm1292_vm6, %v1259_v40 }
 0x57d   : > { %v734_v53 = vpop.permute.xlu1 %733  ;;  %v1099_v41 = vpop.permute.xlu2 %1098  ;;  %v1313_v57 = vld [vmem:[#allocation2 + $0x20] sm:$0xff] }
 0x57e   : > { %770 = vst.msk [vmem:[#allocation2 + $0x60] sm:$0xff] %vm757_vm3, %v734_v53  ;;  %v1327_v44 = vpack.c.bf16 %v1314_v58, %v1313_v57  ;;  %v1316_v45 = vld [vmem:[#allocation2 + $0x38] sm:$0xff] }
 0x57f   : > { %965 = vst.msk [vmem:[#allocation2 + $0x60] sm:$0xff] %vm952_vm4, %v2404_v9 }
 0x580   : > { %1135 = vst.msk [vmem:[#allocation2 + $0x60] sm:$0xff] %vm1122_vm5, %v1099_v41  ;;  %1658 = vmatmul.msk.bf16.gmra.mxu2 %vm1393_vm7, %v1327_v44 }
 0x585   : > { %v1257_v1 = vpop.permute.xlu1 %1256  ;;  %v1263_v6 = vpop.permute.xlu2 %1262 }
 0x586   : > { %1299 = vst.msk [vmem:[#allocation2 + $0x30] sm:$0xff] %vm1292_vm6, %v1257_v1 }
 0x587   : > { %1302 = vst.msk [vmem:[#allocation2 + $0x48] sm:$0xff] %vm1292_vm6, %v1263_v6 }
 0x58d   : > { %v931_v35 = vpop.permute.xlu1 %930  ;;  %v568_v7 = vpop.permute.xlu2 %567  ;;  %v1315_v5 = vld [vmem:[#allocation2 + $0x30] sm:$0xff] }
 0x58e   : > { %966 = vst.msk [vmem:[#allocation2 + $0x68] sm:$0xff] %vm952_vm4, %v931_v35  ;;  %v1328_v0 = vpack.c.bf16 %v1316_v45, %v1315_v5  ;;  %v1318_v13 = vld [vmem:[#allocation2 + $0x48] sm:$0xff] }
 0x58f   : > { %1136 = vst.msk [vmem:[#allocation2 + $0x68] sm:$0xff] %vm1122_vm5, %v2407_v2 }
 0x590   : > { %602 = vst.msk [vmem:[#allocation2 + $0x70] sm:$0xff] %vm587_vm2, %v568_v7  ;;  %1659 = vmatmul.msk.bf16.gmra.mxu2 %vm1393_vm7, %v1328_v0 }
 0x595   : > { %v1261_v9 = vpop.permute.xlu1 %1260  ;;  %v1267_v32 = vpop.permute.xlu2 %1266 }
 0x596   : > { %1301 = vst.msk [vmem:[#allocation2 + $0x40] sm:$0xff] %vm1292_vm6, %v1261_v9 }
 0x597   : > { %1304 = vst.msk [vmem:[#allocation2 + $0x58] sm:$0xff] %vm1292_vm6, %v1267_v32 }
 0x59d   : > { %v400_v17 = vpop.permute.xlu1 %399  ;;  %v740_v60 = vpop.permute.xlu2 %739  ;;  %v1317_v16 = vld [vmem:[#allocation2 + $0x40] sm:$0xff] }
 0x59e   : > { %433 = vst.msk [vmem:[#allocation2 + $0x78] sm:$0xff] %vm417_vm1, %v400_v17  ;;  %v1329_v51 = vpack.c.bf16 %v1318_v13, %v1317_v16  ;;  %v1320_v56 = vld [vmem:[#allocation2 + $0x58] sm:$0xff] }
 0x59f   : > { %603 = vst.msk [vmem:[#allocation2 + $0x78] sm:$0xff] %vm587_vm2, %v570_v8 }
 0x5a0   : > { %773 = vst.msk [vmem:[#allocation2 + $0x78] sm:$0xff] %vm757_vm3, %v740_v60  ;;  %1660 = vmatmul.msk.bf16.gmra.mxu2 %vm1393_vm7, %v1329_v51 }
 0x5a5   : > { %v1265_v2 = vpop.permute.xlu1 %1264  ;;  %v1271_v20 = vpop.permute.xlu2 %1270 }
 0x5a6   : > { %1303 = vst.msk [vmem:[#allocation2 + $0x50] sm:$0xff] %vm1292_vm6, %v1265_v2 }
 0x5a7   : > { %1306 = vst.msk [vmem:[#allocation2 + $0x68] sm:$0xff] %vm1292_vm6, %v1271_v20 }
 0x5ad   : > { %v738_v62 = vpop.permute.xlu1 %737  ;;  %v1319_v14 = vld [vmem:[#allocation2 + $0x50] sm:$0xff]  ;;  %v1103_v19 = vpop.permute.xlu2 %1102 }
 0x5ae   : > { %772 = vst.msk [vmem:[#allocation2 + $0x70] sm:$0xff] %vm757_vm3, %v738_v62  ;;  %v1330_v48 = vpack.c.bf16 %v1320_v56, %v1319_v14  ;;  %v1322_v55 = vld [vmem:[#allocation2 + $0x68] sm:$0xff] }
 0x5af   : > { %967 = vst.msk [vmem:[#allocation2 + $0x70] sm:$0xff] %vm952_vm4, %v933_v25 }
 0x5b0   : > { %1137 = vst.msk [vmem:[#allocation2 + $0x70] sm:$0xff] %vm1122_vm5, %v1103_v19  ;;  %1661 = vmatmul.msk.bf16.gmra.mxu2 %vm1393_vm7, %v1330_v48 }
 0x5b5   : > { %v1269_v42 = vpop.permute.xlu1 %1268  ;;  %v1275_v28 = vpop.permute.xlu2 %1274 }
 0x5b6   : > { %1305 = vst.msk [vmem:[#allocation2 + $0x60] sm:$0xff] %vm1292_vm6, %v1269_v42 }
 0x5bd   : > { %v935_v10 = vpop.permute.xlu1 %934  ;;  %v1321_v23 = vld [vmem:[#allocation2 + $0x60] sm:$0xff] }
 0x5be   : > { %968 = vst.msk [vmem:[#allocation2 + $0x78] sm:$0xff] %vm952_vm4, %v935_v10  ;;  %v1331_v33 = vpack.c.bf16 %v1322_v55, %v1321_v23 }
 0x5bf   : > { %1138 = vst.msk [vmem:[#allocation2 + $0x78] sm:$0xff] %vm1122_vm5, %v1105_v63 }
 0x5c0   : > { %1308 = vst.msk [vmem:[#allocation2 + $0x78] sm:$0xff] %vm1292_vm6, %v1275_v28  ;;  %1662 = vmatmul.msk.bf16.gmra.mxu2 %vm1393_vm7, %v1331_v33 }
 0x5c5   : > { %v1273_v50 = vpop.permute.xlu1 %1272 }
 0x5c6   : > { %1307 = vst.msk [vmem:[#allocation2 + $0x70] sm:$0xff] %vm1292_vm6, %v1273_v50 }
 0x5c7   : > { %v1324_v43 = vld [vmem:[#allocation2 + $0x78] sm:$0xff] }
 0x5cd   : > { %v1323_v46 = vld [vmem:[#allocation2 + $0x70] sm:$0xff] }
 0x5ce   : > { %v1332_v29 = vpack.c.bf16 %v1324_v43, %v1323_v46 }
 0x5d0   : > { %1663 = vmatmul.msk.bf16.gmra.mxu2 %vm1393_vm7, %v1332_v29 }
 0x5e3   : > { %v1427_v52 = vpop.f32.mrf.mxu2 }
 0x5e4   : > { %v1428_v47 = vadd.f32 %v1729_v61, %v1427_v52 }
 0x5e6   : > { %1468 = vst.msk [vmem:[%s2549_s5] sm:$0xff] %vm1467_vm8, %v1428_v47 }
 0x5eb   : > { %v1429_v12 = vpop.f32.mrf.mxu2 }
 0x5ec   : > { %v1430_v30 = vadd.f32 %v1729_v61, %v1429_v12 }
 0x5ee   : > { %1469 = vst.msk [vmem:[%s2549_s5 + $0x8] sm:$0xff] %vm1467_vm8, %v1430_v30 }
 0x5f3   : > { %v1432_v59 = vpop.f32.mrf.mxu2 }
 0x5f4   : > { %v1433_v21 = vadd.f32 %v1729_v61, %v1432_v59 }
 0x5f6   : > { %1470 = vst.msk [vmem:[%s2549_s5 + $0x10] sm:$0xff] %vm1467_vm8, %v1433_v21 }
 0x5fb   : > { %v1434_v4 = vpop.f32.mrf.mxu2 }
 0x5fc   : > { %v1435_v34 = vadd.f32 %v1729_v61, %v1434_v4 }
 0x5fe   : > { %1471 = vst.msk [vmem:[%s2549_s5 + $0x18] sm:$0xff] %vm1467_vm8, %v1435_v34 }
 0x603   : > { %v1437_v18 = vpop.f32.mrf.mxu2 }
 0x604   : > { %v1438_v54 = vadd.f32 %v1729_v61, %v1437_v18 }
 0x606   : > { %1472 = vst.msk [vmem:[%s2549_s5 + $0x20] sm:$0xff] %vm1467_vm8, %v1438_v54 }
 0x60b   : > { %v1439_v3 = vpop.f32.mrf.mxu2 }
 0x60c   : > { %v1440_v36 = vadd.f32 %v1729_v61, %v1439_v3 }
 0x60e   : > { %1473 = vst.msk [vmem:[%s2549_s5 + $0x28] sm:$0xff] %vm1467_vm8, %v1440_v36 }
 0x613   : > { %v1442_v24 = vpop.f32.mrf.mxu2 }
 0x614   : > { %v1443_v11 = vadd.f32 %v1729_v61, %v1442_v24 }
 0x616   : > { %1474 = vst.msk [vmem:[%s2549_s5 + $0x30] sm:$0xff] %vm1467_vm8, %v1443_v11 }
 0x61b   : > { %v1444_v39 = vpop.f32.mrf.mxu2 }
 0x61c   : > { %v1445_v38 = vadd.f32 %v1729_v61, %v1444_v39 }
 0x61e   : > { %1475 = vst.msk [vmem:[%s2549_s5 + $0x38] sm:$0xff] %vm1467_vm8, %v1445_v38 }
 0x623   : > { %v1447_v49 = vpop.f32.mrf.mxu2 }
 0x624   : > { %v1448_v26 = vadd.f32 %v1729_v61, %v1447_v49 }
 0x626   : > { %1476 = vst.msk [vmem:[%s2549_s5 + $0x40] sm:$0xff] %vm1467_vm8, %v1448_v26 }
 0x62b   : > { %v1449_v27 = vpop.f32.mrf.mxu2 }
 0x62c   : > { %v1450_v15 = vadd.f32 %v1729_v61, %v1449_v27 }
 0x62e   : > { %1477 = vst.msk [vmem:[%s2549_s5 + $0x48] sm:$0xff] %vm1467_vm8, %v1450_v15 }
 0x633   : > { %v1452_v31 = vpop.f32.mrf.mxu2 }
 0x634   : > { %v1453_v22 = vadd.f32 %v1729_v61, %v1452_v31 }
 0x636   : > { %1478 = vst.msk [vmem:[%s2549_s5 + $0x50] sm:$0xff] %vm1467_vm8, %v1453_v22 }
 0x63b   : > { %v1454_v37 = vpop.f32.mrf.mxu2 }
 0x63c   : > { %v1455_v40 = vadd.f32 %v1729_v61, %v1454_v37 }
 0x63e   : > { %1479 = vst.msk [vmem:[%s2549_s5 + $0x58] sm:$0xff] %vm1467_vm8, %v1455_v40 }
 0x643   : > { %v1457_v53 = vpop.f32.mrf.mxu2 }
 0x644   : > { %v1458_v41 = vadd.f32 %v1729_v61, %v1457_v53 }
 0x646   : > { %1480 = vst.msk [vmem:[%s2549_s5 + $0x60] sm:$0xff] %vm1467_vm8, %v1458_v41 }
 0x64b   : > { %v1459_v57 = vpop.f32.mrf.mxu2 }
 0x64c   : > { %v1460_v58 = vadd.f32 %v1729_v61, %v1459_v57 }
 0x64e   : > { %1481 = vst.msk [vmem:[%s2549_s5 + $0x68] sm:$0xff] %vm1467_vm8, %v1460_v58 }
 0x653   : > { %v1462_v44 = vpop.f32.mrf.mxu2 }
 0x654   : > { %v1463_v1 = vadd.f32 %v1729_v61, %v1462_v44 }
 0x656   : > { %1482 = vst.msk [vmem:[%s2549_s5 + $0x70] sm:$0xff] %vm1467_vm8, %v1463_v1 }
 0x65b   : > { %v1464_v6 = vpop.f32.mrf.mxu2 }
 0x65c   : > { %v1465_v35 = vadd.f32 %v1729_v61, %v1464_v6 }
 0x65e   : > { %1483 = vst.msk [vmem:[%s2549_s5 + $0x78] sm:$0xff] %vm1467_vm8, %v1465_v35 }
 0x65f PF: > { %s14_s15 = sadd.s32 1, %s1736_s15  }
 0x660   : > { %p11_p4 = scmp.ge.s32.totalorder %s14_s15, 4  }
 0x662   :  { %13 = sbr.rel (!%p11_p4) target bundleno = 1 (0x1), region = 67 }

</bundles_post_ra>
